<compile_context>
chip_gen: v6e
topology: v6e:2x2x1
jax: 0.10.0
libtpu: 0.0.40
codegen_flags: <defaults>
</compile_context>

<pallas_src>
import math

import jax
import jax.numpy as jnp
from jax.experimental import pallas as pl
from jax.experimental.pallas import tpu as pltpu

# ---------------- model dims (small, consistent with MyTransformer) ----------------
S = 8                        # sequence length (T)
B = 2                        # batch
D_MODEL = 32
N_HEADS = 4
D_HEAD = D_MODEL // N_HEADS  # 8
D_FF = 64                    # dim_feedforward
NLAYERS = 2
NTOKEN = 64
LN_EPS = 1e-5

BH = B * N_HEADS             # 8 stacked (batch, head) blocks
BS = B * S                   # 16 fused rows
NEG = -1e30                  # "-inf" mask value (finite: avoids inf arithmetic in-kernel)

# packed per-layer weight slab column offsets: [Wqkv(96) | Wout(32) | W1(64) | W2^T(64)]
_QKV0, _QKV1 = 0, 3 * D_MODEL
_WOUT0, _WOUT1 = _QKV1, _QKV1 + D_MODEL
_W10, _W11 = _WOUT1, _WOUT1 + D_FF
_W20, _W21 = _W11, _W11 + D_FF            # = 256


def _layer_norm(z, w, b):
    mu = jnp.mean(z, axis=-1, keepdims=True)
    var = jnp.mean((z - mu) ** 2, axis=-1, keepdims=True)
    return (z - mu) * jax.lax.rsqrt(var + LN_EPS) * w + b


def my_transformer_kernel(ids_ref, pe_ref, mask_ref, tok_ref, wmat_ref, vecs_ref,
                          blin_ref, out_ref):
    # ---- embedding (gather-free one-hot matmul; sqrt(d_model) pre-folded into the table)
    ids = ids_ref[...]                                                     # (BS, 1) int32
    iota = jax.lax.broadcasted_iota(jnp.int32, (BS, NTOKEN), 1)
    onehot = jnp.where(iota == ids, 1.0, 0.0).astype(jnp.bfloat16)         # (BS, NTOKEN)
    tok = tok_ref[...]                                                     # (NTOKEN, 2*D) bf16
    x = jnp.dot(onehot, tok[:, :D_MODEL],
                preferred_element_type=jnp.float32) + pe_ref[...]          # (BS, D) f32

    mask = mask_ref[...]                                                   # (BH*S, BH*S) f32

    for l in range(NLAYERS):                      # static unroll (NLAYERS is small)
        wm = wmat_ref[l]                          # (D, 256) bf16
        vec = vecs_ref[l]                         # (8, D_FF) f32
        b1 = vec[0:1, :]
        b2 = vec[1:2, :D_MODEL]
        ln1w, ln1b = vec[2:3, :D_MODEL], vec[3:4, :D_MODEL]
        ln2w, ln2b = vec[4:5, :D_MODEL], vec[5:6, :D_MODEL]

        # ---- fused QKV projection (1/sqrt(d_head) pre-folded into the Q columns)
        qkv = jnp.dot(x.astype(jnp.bfloat16), wm[:, _QKV0:_QKV1],
                      preferred_element_type=jnp.float32)                  # (BS, 3*D)

        # ---- block-diagonal attention over all (batch, head) pairs at once
        def stack(off):                                                    # -> (BH*S, D_HEAD)
            return jnp.concatenate(
                [qkv[b * S:(b + 1) * S, off + h * D_HEAD: off + (h + 1) * D_HEAD]
                 for b in range(B) for h in range(N_HEADS)], axis=0)

        q_st = stack(0).astype(jnp.bfloat16)
        k_st = stack(D_MODEL).astype(jnp.bfloat16)
        v_st = stack(2 * D_MODEL).astype(jnp.bfloat16)

        s = jax.lax.dot_general(q_st, k_st, (((1,), (1,)), ((), ())),
                                preferred_element_type=jnp.float32)        # (BH*S, BH*S)
        s = s + mask
        m = jnp.max(s, axis=-1, keepdims=True)
        e = jnp.exp(s - m)
        p = e * pl.reciprocal(jnp.sum(e, axis=-1, keepdims=True), approx=True)
        pv = jnp.dot(p.astype(jnp.bfloat16), v_st,
                     preferred_element_type=jnp.float32)                   # (BH*S, D_HEAD)

        # ---- lane-place head outputs back into one (BS, D) context tile; single W_out matmul
        ctx = jnp.concatenate(
            [jnp.concatenate([pv[(b * N_HEADS + h) * S:(b * N_HEADS + h + 1) * S, :]
                              for h in range(N_HEADS)], axis=1)
             for b in range(B)], axis=0)                                   # (BS, D)
        attn = jnp.dot(ctx.astype(jnp.bfloat16), wm[:, _WOUT0:_WOUT1],
                       preferred_element_type=jnp.float32)                 # (BS, D)

        # ---- residual + LN1, feed-forward, residual (from BLOCK input) + LN2 -- all f32
        h1 = _layer_norm(x + attn, ln1w, ln1b)
        ff = jnp.dot(h1.astype(jnp.bfloat16), wm[:, _W10:_W11],
                     preferred_element_type=jnp.float32) + b1              # (BS, D_FF)
        ff = jnp.maximum(ff, 0.0)
        ff = jax.lax.dot_general(ff.astype(jnp.bfloat16), wm[:, _W20:_W21],
                                 (((1,), (1,)), ((), ())),
                                 preferred_element_type=jnp.float32) + b2  # (BS, D)
        x = _layer_norm(x + ff, ln2w, ln2b)

    # ---- final linear + log_softmax (f32 elementwise)
    logits = jax.lax.dot_general(x.astype(jnp.bfloat16), tok[:, D_MODEL:],
                                 (((1,), (1,)), ((), ())),
                                 preferred_element_type=jnp.float32) + blin_ref[...]
    lm = jnp.max(logits, axis=-1, keepdims=True)
    lse = lm + jnp.log(jnp.sum(jnp.exp(logits - lm), axis=-1, keepdims=True))
    logp = logits - lse                                                    # (BS, NTOKEN)

    # lane-dense (S, B*NTOKEN) = (8, 128) store; wrapper reshape to (T, B, NTOKEN) is free
    out_ref[...] = jnp.concatenate([logp[b * S:(b + 1) * S, :] for b in range(B)], axis=1)


# ----------------------------- one-time parameter packing -----------------------------
def make_positional_encoding(seq, d):
    pos = jnp.arange(seq, dtype=jnp.float32)[:, None]
    div = jnp.exp(-math.log(10000.0) * jnp.arange(0, d, 2, dtype=jnp.float32) / d)
    ang = pos * div
    pe = jnp.zeros((seq, d), jnp.float32)
    pe = pe.at[:, 0::2].set(jnp.sin(ang))
    pe = pe.at[:, 1::2].set(jnp.cos(ang))
    return pe                                               # (seq, d)


def build_fused_attention_mask():
    causal = jnp.where(jnp.arange(S)[None, :] <= jnp.arange(S)[:, None], 0.0, NEG)
    full = jnp.full((BH * S, BH * S), NEG, jnp.float32)
    for j in range(BH):
        full = full.at[j * S:(j + 1) * S, j * S:(j + 1) * S].set(causal)
    return full


def pack_params(p):
    """Pack/fold parameters ONCE (not in the per-call path)."""
    def heads_to_cols(w):                                   # (H, D, DH) -> (D, H*DH)
        return jnp.transpose(w, (1, 0, 2)).reshape(D_MODEL, D_MODEL)

    mats, vecs = [], []
    for l in range(NLAYERS):
        wq = heads_to_cols(p["wq"][l]) * (1.0 / math.sqrt(D_HEAD))   # fold score scaling
        wk = heads_to_cols(p["wk"][l])
        wv = heads_to_cols(p["wv"][l])
        mats.append(jnp.concatenate(
            [wq, wk, wv, p["wout"][l], p["w1"][l], p["w2"][l].T], axis=1))     # (D, 256)
        v = jnp.zeros((8, D_FF), jnp.float32)
        v = v.at[0, :].set(p["b1"][l])
        v = v.at[1, :D_MODEL].set(p["b2"][l])
        v = v.at[2, :D_MODEL].set(p["ln1_w"][l])
        v = v.at[3, :D_MODEL].set(p["ln1_b"][l])
        v = v.at[4, :D_MODEL].set(p["ln2_w"][l])
        v = v.at[5, :D_MODEL].set(p["ln2_b"][l])
        vecs.append(v)

    return {
        "pe_x": jnp.tile(make_positional_encoding(S, D_MODEL), (B, 1)),        # (BS, D)
        "mask": build_fused_attention_mask(),                                  # (64, 64)
        "tok": jnp.concatenate([p["emb"] * math.sqrt(D_MODEL), p["wlin"].T],
                               axis=1).astype(jnp.bfloat16),                   # (NTOKEN, 2*D)
        "wmat": jnp.stack(mats).astype(jnp.bfloat16),                          # (L, D, 256)
        "vecs": jnp.stack(vecs),                                               # (L, 8, D_FF)
        "blin": p["blin"].reshape(1, NTOKEN),                                  # (1, NTOKEN)
    }


@jax.jit
def my_transformer_pallas(src_tb, packed):
    """src_tb: (T, B) int32 token ids.  Returns (T, B, NTOKEN) f32 log-probs."""
    # batch-major row ids (row b*S + t = src[t, b]); tiny int transpose only
    ids = jnp.transpose(src_tb, (1, 0)).reshape(BS, 1).astype(jnp.int32)
    vmem = lambda: pl.BlockSpec(memory_space=pltpu.MemorySpace.VMEM)
    out2d = pl.pallas_call(
        my_transformer_kernel,
        out_shape=jax.ShapeDtypeStruct((S, B * NTOKEN), jnp.float32),
        in_specs=[vmem() for _ in range(7)],
        out_specs=vmem(),
    )(ids, packed["pe_x"], packed["mask"], packed["tok"], packed["wmat"],
      packed["vecs"], packed["blin"])
    return out2d.reshape(S, B, NTOKEN)


# ---------------- pure-JAX reference (mirrors the PyTorch forward, all f32) ----------------
def reference_forward(src_tb, p):
    x = p["emb"][src_tb] * math.sqrt(D_MODEL)                              # (T, B, D)
    x = x + make_positional_encoding(S, D_MODEL)[:, None, :]
    mask = jnp.where(jnp.arange(S)[None, :] <= jnp.arange(S)[:, None], 0.0, -jnp.inf)
    for l in range(NLAYERS):
        head_outs = []
        for h in range(N_HEADS):
            Q = x @ p["wq"][l, h]
            K = x @ p["wk"][l, h]
            V = x @ p["wv"][l, h]
            Qb, Kb, Vb = (jnp.transpose(t, (1, 0, 2)) for t in (Q, K, V))
            scores = Qb @ jnp.transpose(Kb, (0, 2, 1)) / math.sqrt(D_HEAD) + mask
            attn = jax.nn.softmax(scores, axis=-1)
            head_outs.append(jnp.transpose(attn @ Vb, (1, 0, 2)))
        attn_out = jnp.concatenate(head_outs, axis=-1) @ p["wout"][l]
        h1 = _layer_norm(x + attn_out, p["ln1_w"][l], p["ln1_b"][l])
        ff = jnp.maximum(h1 @ p["w1"][l] + p["b1"][l], 0.0) @ p["w2"][l] + p["b2"][l]
        x = _layer_norm(x + ff, p["ln2_w"][l], p["ln2_b"][l])
    logits = x @ p["wlin"] + p["blin"]
    return jax.nn.log_softmax(logits, axis=-1)


def init_params(key):
    ks = jax.random.split(key, 10)
    w = 0.06

    def rnd(k, shape, scale):
        return scale * jax.random.normal(k, shape, jnp.float32)

    return {
        # nn.Linear weights stored as (in, out) == PyTorch weight.T (initialized directly)
        "emb":  rnd(ks[0], (NTOKEN, D_MODEL), 0.2),
        "wq":   rnd(ks[1], (NLAYERS, N_HEADS, D_MODEL, D_HEAD), w),
        "wk":   rnd(ks[2], (NLAYERS, N_HEADS, D_MODEL, D_HEAD), w),
        "wv":   rnd(ks[3], (NLAYERS, N_HEADS, D_MODEL, D_HEAD), w),
        "wout": rnd(ks[4], (NLAYERS, D_MODEL, D_MODEL), w),
        "w1":   rnd(ks[5], (NLAYERS, D_MODEL, D_FF), w),
        "b1":   rnd(ks[6], (NLAYERS, D_FF), w),
        "w2":   rnd(ks[7], (NLAYERS, D_FF, D_MODEL), w),
        "b2":   rnd(ks[8], (NLAYERS, D_MODEL), w),
        # LayerNorm defaults: weight=1, bias=0 (PyTorch default init)
        "ln1_w": jnp.ones((NLAYERS, D_MODEL), jnp.float32),
        "ln1_b": jnp.zeros((NLAYERS, D_MODEL), jnp.float32),
        "ln2_w": jnp.ones((NLAYERS, D_MODEL), jnp.float32),
        "ln2_b": jnp.zeros((NLAYERS, D_MODEL), jnp.float32),
        # final linear: xavier-style weight, zero bias (per MyTransformer._init_weights)
        "wlin": rnd(ks[9], (D_MODEL, NTOKEN), w),
        "blin": jnp.zeros((NTOKEN,), jnp.float32),
    }


if __name__ == "__main__":
    key = jax.random.PRNGKey(0)
    k_src, k_par = jax.random.split(key)

    # token ids in PyTorch layout (T, B)
    src = jax.random.randint(k_src, (S, B), 0, NTOKEN, dtype=jnp.int32)
    params = init_params(k_par)
    packed = pack_params(params)          # one-time packing / folding

    out = my_transformer_pallas(src, packed)
    out = jax.block_until_ready(out)

    ref = reference_forward(src, params)
    max_err = float(jnp.max(jnp.abs(out - ref)))
    assert out.shape == (S, B, NTOKEN)
    # bf16 MXU operands (f32 accumulate, f32 elementwise) => small deviation vs all-f32 ref
    assert max_err < 3e-2, f"mismatch vs reference, max_err={max_err}"

    print("KERNEL_OK")
</pallas_src>

<mosaic_0001>
module attributes {stable_mosaic.version = 11 : i64} {
  func.func @my_transformer_kernel(%arg0: memref<16x1xi32, #tpu.memory_space<vmem>>, %arg1: memref<16x32xf32, #tpu.memory_space<vmem>>, %arg2: memref<64x64xf32, #tpu.memory_space<vmem>>, %arg3: memref<64x64xbf16, #tpu.memory_space<vmem>>, %arg4: memref<2x32x256xbf16, #tpu.memory_space<vmem>>, %arg5: memref<2x8x64xf32, #tpu.memory_space<vmem>>, %arg6: memref<1x64xf32, #tpu.memory_space<vmem>>, %arg7: memref<8x128xf32, #tpu.memory_space<vmem>>) attributes {dimension_semantics = [], scalar_prefetch = 0 : i64, scratch_operands = 0 : i64, tpu.core_type = #tpu.core_type<tc>} {
    %c0 = arith.constant 0 : index
    %c0_0 = arith.constant 0 : index
    %0 = vector.load %arg0[%c0, %c0_0] : memref<16x1xi32, #tpu.memory_space<vmem>>, vector<16x1xi32>
    %1 = tpu.iota {dimensions = array<i32: 1>} : vector<16x64xi32>
    %2 = vector.broadcast %0 : vector<16x1xi32> to vector<16x64xi32>
    %3 = arith.cmpi eq, %1, %2 : vector<16x64xi32>
    %cst = arith.constant 1.000000e+00 : f32
    %cst_1 = arith.constant 0.000000e+00 : f32
    %4 = vector.broadcast %cst : f32 to vector<16x64xf32>
    %5 = vector.broadcast %cst_1 : f32 to vector<16x64xf32>
    %6 = arith.select %3, %4, %5 : vector<16x64xi1>, vector<16x64xf32>
    %7 = arith.truncf %6 : vector<16x64xf32> to vector<16x64xbf16>
    %c0_2 = arith.constant 0 : index
    %c0_3 = arith.constant 0 : index
    %8 = vector.load %arg3[%c0_2, %c0_3] : memref<64x64xbf16, #tpu.memory_space<vmem>>, vector<64x64xbf16>
    %9 = vector.extract_strided_slice %8 {offsets = [0, 0], sizes = [64, 32], strides = [1, 1]} : vector<64x64xbf16> to vector<64x32xbf16>
    %cst_4 = arith.constant dense<0.000000e+00> : vector<16x32xf32>
    %10 = tpu.matmul %7, %9, %cst_4 {dimension_numbers = #tpu.dot_dimension_numbers<[1], [0], [0], [1], [0, 0, 1, 1], [], []>} : vector<16x64xbf16>, vector<64x32xbf16>, vector<16x32xf32> -> vector<16x32xf32>
    %c0_5 = arith.constant 0 : index
    %c0_6 = arith.constant 0 : index
    %11 = vector.load %arg1[%c0_5, %c0_6] : memref<16x32xf32, #tpu.memory_space<vmem>>, vector<16x32xf32>
    %12 = arith.addf %10, %11 : vector<16x32xf32>
    %c0_7 = arith.constant 0 : index
    %c0_8 = arith.constant 0 : index
    %13 = vector.load %arg2[%c0_7, %c0_8] : memref<64x64xf32, #tpu.memory_space<vmem>>, vector<64x64xf32>
    %c0_9 = arith.constant 0 : index
    %c0_10 = arith.constant 0 : index
    %c0_11 = arith.constant 0 : index
    %14 = vector.load %arg4[%c0_9, %c0_10, %c0_11] : memref<2x32x256xbf16, #tpu.memory_space<vmem>>, vector<1x32x256xbf16>
    %15 = vector.shape_cast %14 : vector<1x32x256xbf16> to vector<32x256xbf16>
    %c0_12 = arith.constant 0 : index
    %c0_13 = arith.constant 0 : index
    %c0_14 = arith.constant 0 : index
    %16 = vector.load %arg5[%c0_12, %c0_13, %c0_14] : memref<2x8x64xf32, #tpu.memory_space<vmem>>, vector<1x8x64xf32>
    %17 = vector.shape_cast %16 : vector<1x8x64xf32> to vector<8x64xf32>
    %18 = vector.extract_strided_slice %17 {offsets = [0, 0], sizes = [1, 64], strides = [1, 1]} : vector<8x64xf32> to vector<1x64xf32>
    %19 = vector.extract_strided_slice %17 {offsets = [1, 0], sizes = [1, 32], strides = [1, 1]} : vector<8x64xf32> to vector<1x32xf32>
    %20 = vector.extract_strided_slice %17 {offsets = [2, 0], sizes = [1, 32], strides = [1, 1]} : vector<8x64xf32> to vector<1x32xf32>
    %21 = vector.extract_strided_slice %17 {offsets = [3, 0], sizes = [1, 32], strides = [1, 1]} : vector<8x64xf32> to vector<1x32xf32>
    %22 = vector.extract_strided_slice %17 {offsets = [4, 0], sizes = [1, 32], strides = [1, 1]} : vector<8x64xf32> to vector<1x32xf32>
    %23 = vector.extract_strided_slice %17 {offsets = [5, 0], sizes = [1, 32], strides = [1, 1]} : vector<8x64xf32> to vector<1x32xf32>
    %24 = arith.truncf %12 : vector<16x32xf32> to vector<16x32xbf16>
    %25 = vector.extract_strided_slice %15 {offsets = [0, 0], sizes = [32, 96], strides = [1, 1]} : vector<32x256xbf16> to vector<32x96xbf16>
    %cst_15 = arith.constant dense<0.000000e+00> : vector<16x96xf32>
    %26 = tpu.matmul %24, %25, %cst_15 {dimension_numbers = #tpu.dot_dimension_numbers<[1], [0], [0], [1], [0, 0, 1, 1], [], []>} : vector<16x32xbf16>, vector<32x96xbf16>, vector<16x96xf32> -> vector<16x96xf32>
    %27 = vector.extract_strided_slice %26 {offsets = [0, 0], sizes = [8, 8], strides = [1, 1]} : vector<16x96xf32> to vector<8x8xf32>
    %28 = vector.extract_strided_slice %26 {offsets = [0, 8], sizes = [8, 8], strides = [1, 1]} : vector<16x96xf32> to vector<8x8xf32>
    %29 = vector.extract_strided_slice %26 {offsets = [0, 16], sizes = [8, 8], strides = [1, 1]} : vector<16x96xf32> to vector<8x8xf32>
    %30 = vector.extract_strided_slice %26 {offsets = [0, 24], sizes = [8, 8], strides = [1, 1]} : vector<16x96xf32> to vector<8x8xf32>
    %31 = vector.extract_strided_slice %26 {offsets = [8, 0], sizes = [8, 8], strides = [1, 1]} : vector<16x96xf32> to vector<8x8xf32>
    %32 = vector.extract_strided_slice %26 {offsets = [8, 8], sizes = [8, 8], strides = [1, 1]} : vector<16x96xf32> to vector<8x8xf32>
    %33 = vector.extract_strided_slice %26 {offsets = [8, 16], sizes = [8, 8], strides = [1, 1]} : vector<16x96xf32> to vector<8x8xf32>
    %34 = vector.extract_strided_slice %26 {offsets = [8, 24], sizes = [8, 8], strides = [1, 1]} : vector<16x96xf32> to vector<8x8xf32>
    %35 = tpu.concatenate %27, %28, %29, %30, %31, %32, %33, %34 in 0 : vector<8x8xf32>, vector<8x8xf32>, vector<8x8xf32>, vector<8x8xf32>, vector<8x8xf32>, vector<8x8xf32>, vector<8x8xf32>, vector<8x8xf32> -> vector<64x8xf32>
    %36 = arith.truncf %35 : vector<64x8xf32> to vector<64x8xbf16>
    %37 = vector.extract_strided_slice %26 {offsets = [0, 32], sizes = [8, 8], strides = [1, 1]} : vector<16x96xf32> to vector<8x8xf32>
    %38 = vector.extract_strided_slice %26 {offsets = [0, 40], sizes = [8, 8], strides = [1, 1]} : vector<16x96xf32> to vector<8x8xf32>
    %39 = vector.extract_strided_slice %26 {offsets = [0, 48], sizes = [8, 8], strides = [1, 1]} : vector<16x96xf32> to vector<8x8xf32>
    %40 = vector.extract_strided_slice %26 {offsets = [0, 56], sizes = [8, 8], strides = [1, 1]} : vector<16x96xf32> to vector<8x8xf32>
    %41 = vector.extract_strided_slice %26 {offsets = [8, 32], sizes = [8, 8], strides = [1, 1]} : vector<16x96xf32> to vector<8x8xf32>
    %42 = vector.extract_strided_slice %26 {offsets = [8, 40], sizes = [8, 8], strides = [1, 1]} : vector<16x96xf32> to vector<8x8xf32>
    %43 = vector.extract_strided_slice %26 {offsets = [8, 48], sizes = [8, 8], strides = [1, 1]} : vector<16x96xf32> to vector<8x8xf32>
    %44 = vector.extract_strided_slice %26 {offsets = [8, 56], sizes = [8, 8], strides = [1, 1]} : vector<16x96xf32> to vector<8x8xf32>
    %45 = tpu.concatenate %37, %38, %39, %40, %41, %42, %43, %44 in 0 : vector<8x8xf32>, vector<8x8xf32>, vector<8x8xf32>, vector<8x8xf32>, vector<8x8xf32>, vector<8x8xf32>, vector<8x8xf32>, vector<8x8xf32> -> vector<64x8xf32>
    %46 = arith.truncf %45 : vector<64x8xf32> to vector<64x8xbf16>
    %47 = vector.extract_strided_slice %26 {offsets = [0, 64], sizes = [8, 8], strides = [1, 1]} : vector<16x96xf32> to vector<8x8xf32>
    %48 = vector.extract_strided_slice %26 {offsets = [0, 72], sizes = [8, 8], strides = [1, 1]} : vector<16x96xf32> to vector<8x8xf32>
    %49 = vector.extract_strided_slice %26 {offsets = [0, 80], sizes = [8, 8], strides = [1, 1]} : vector<16x96xf32> to vector<8x8xf32>
    %50 = vector.extract_strided_slice %26 {offsets = [0, 88], sizes = [8, 8], strides = [1, 1]} : vector<16x96xf32> to vector<8x8xf32>
    %51 = vector.extract_strided_slice %26 {offsets = [8, 64], sizes = [8, 8], strides = [1, 1]} : vector<16x96xf32> to vector<8x8xf32>
    %52 = vector.extract_strided_slice %26 {offsets = [8, 72], sizes = [8, 8], strides = [1, 1]} : vector<16x96xf32> to vector<8x8xf32>
    %53 = vector.extract_strided_slice %26 {offsets = [8, 80], sizes = [8, 8], strides = [1, 1]} : vector<16x96xf32> to vector<8x8xf32>
    %54 = vector.extract_strided_slice %26 {offsets = [8, 88], sizes = [8, 8], strides = [1, 1]} : vector<16x96xf32> to vector<8x8xf32>
    %55 = tpu.concatenate %47, %48, %49, %50, %51, %52, %53, %54 in 0 : vector<8x8xf32>, vector<8x8xf32>, vector<8x8xf32>, vector<8x8xf32>, vector<8x8xf32>, vector<8x8xf32>, vector<8x8xf32>, vector<8x8xf32> -> vector<64x8xf32>
    %56 = arith.truncf %55 : vector<64x8xf32> to vector<64x8xbf16>
    %cst_16 = arith.constant dense<0.000000e+00> : vector<64x64xf32>
    %57 = tpu.matmul %36, %46, %cst_16 {dimension_numbers = #tpu.dot_dimension_numbers<[1], [1], [0], [0], [0, 0, 1, 0], [], []>} : vector<64x8xbf16>, vector<64x8xbf16>, vector<64x64xf32> -> vector<64x64xf32>
    %58 = arith.addf %57, %13 : vector<64x64xf32>
    %cst_17 = arith.constant dense<0xFF800000> : vector<64xf32>
    %59 = vector.multi_reduction <maximumf>, %58, %cst_17 [1] : vector<64x64xf32> to vector<64xf32>
    %60 = vector.shape_cast %59 : vector<64xf32> to vector<64x1xf32>
    %61 = vector.broadcast %60 : vector<64x1xf32> to vector<64x64xf32>
    %62 = arith.subf %58, %61 : vector<64x64xf32>
    %63 = math.exp %62 : vector<64x64xf32>
    %cst_18 = arith.constant dense<0.000000e+00> : vector<64xf32>
    %64 = vector.multi_reduction <add>, %63, %cst_18 [1] : vector<64x64xf32> to vector<64xf32>
    %65 = vector.shape_cast %64 : vector<64xf32> to vector<64x1xf32>
    %66 = tpu.reciprocal %65 {approx = true} : vector<64x1xf32> -> vector<64x1xf32>
    %67 = vector.broadcast %66 : vector<64x1xf32> to vector<64x64xf32>
    %68 = arith.mulf %63, %67 : vector<64x64xf32>
    %69 = arith.truncf %68 : vector<64x64xf32> to vector<64x64xbf16>
    %cst_19 = arith.constant dense<0.000000e+00> : vector<64x8xf32>
    %70 = tpu.matmul %69, %56, %cst_19 {dimension_numbers = #tpu.dot_dimension_numbers<[1], [0], [0], [1], [0, 0, 1, 1], [], []>} : vector<64x64xbf16>, vector<64x8xbf16>, vector<64x8xf32> -> vector<64x8xf32>
    %71 = vector.extract_strided_slice %70 {offsets = [0, 0], sizes = [8, 8], strides = [1, 1]} : vector<64x8xf32> to vector<8x8xf32>
    %72 = vector.extract_strided_slice %70 {offsets = [8, 0], sizes = [8, 8], strides = [1, 1]} : vector<64x8xf32> to vector<8x8xf32>
    %73 = vector.extract_strided_slice %70 {offsets = [16, 0], sizes = [8, 8], strides = [1, 1]} : vector<64x8xf32> to vector<8x8xf32>
    %74 = vector.extract_strided_slice %70 {offsets = [24, 0], sizes = [8, 8], strides = [1, 1]} : vector<64x8xf32> to vector<8x8xf32>
    %75 = tpu.concatenate %71, %72, %73, %74 in 1 : vector<8x8xf32>, vector<8x8xf32>, vector<8x8xf32>, vector<8x8xf32> -> vector<8x32xf32>
    %76 = vector.extract_strided_slice %70 {offsets = [32, 0], sizes = [8, 8], strides = [1, 1]} : vector<64x8xf32> to vector<8x8xf32>
    %77 = vector.extract_strided_slice %70 {offsets = [40, 0], sizes = [8, 8], strides = [1, 1]} : vector<64x8xf32> to vector<8x8xf32>
    %78 = vector.extract_strided_slice %70 {offsets = [48, 0], sizes = [8, 8], strides = [1, 1]} : vector<64x8xf32> to vector<8x8xf32>
    %79 = vector.extract_strided_slice %70 {offsets = [56, 0], sizes = [8, 8], strides = [1, 1]} : vector<64x8xf32> to vector<8x8xf32>
    %80 = tpu.concatenate %76, %77, %78, %79 in 1 : vector<8x8xf32>, vector<8x8xf32>, vector<8x8xf32>, vector<8x8xf32> -> vector<8x32xf32>
    %81 = tpu.concatenate %75, %80 in 0 : vector<8x32xf32>, vector<8x32xf32> -> vector<16x32xf32>
    %82 = arith.truncf %81 : vector<16x32xf32> to vector<16x32xbf16>
    %83 = vector.extract_strided_slice %15 {offsets = [0, 96], sizes = [32, 32], strides = [1, 1]} : vector<32x256xbf16> to vector<32x32xbf16>
    %cst_20 = arith.constant dense<0.000000e+00> : vector<16x32xf32>
    %84 = tpu.matmul %82, %83, %cst_20 {dimension_numbers = #tpu.dot_dimension_numbers<[1], [0], [0], [1], [0, 0, 1, 1], [], []>} : vector<16x32xbf16>, vector<32x32xbf16>, vector<16x32xf32> -> vector<16x32xf32>
    %85 = arith.addf %12, %84 : vector<16x32xf32>
    %cst_21 = arith.constant dense<0.000000e+00> : vector<16xf32>
    %86 = vector.multi_reduction <add>, %85, %cst_21 [1] : vector<16x32xf32> to vector<16xf32>
    %87 = vector.shape_cast %86 : vector<16xf32> to vector<16x1xf32>
    %cst_22 = arith.constant 3.200000e+01 : f32
    %88 = vector.broadcast %cst_22 : f32 to vector<16x1xf32>
    %89 = arith.divf %87, %88 : vector<16x1xf32>
    %90 = vector.broadcast %89 : vector<16x1xf32> to vector<16x32xf32>
    %91 = arith.subf %85, %90 : vector<16x32xf32>
    %92 = arith.mulf %91, %91 : vector<16x32xf32>
    %cst_23 = arith.constant dense<0.000000e+00> : vector<16xf32>
    %93 = vector.multi_reduction <add>, %92, %cst_23 [1] : vector<16x32xf32> to vector<16xf32>
    %94 = vector.shape_cast %93 : vector<16xf32> to vector<16x1xf32>
    %cst_24 = arith.constant 3.200000e+01 : f32
    %95 = vector.broadcast %cst_24 : f32 to vector<16x1xf32>
    %96 = arith.divf %94, %95 : vector<16x1xf32>
    %97 = vector.broadcast %89 : vector<16x1xf32> to vector<16x32xf32>
    %98 = arith.subf %85, %97 : vector<16x32xf32>
    %cst_25 = arith.constant 9.99999974E-6 : f32
    %99 = vector.broadcast %cst_25 : f32 to vector<16x1xf32>
    %100 = arith.addf %96, %99 : vector<16x1xf32>
    %101 = math.rsqrt %100 : vector<16x1xf32>
    %102 = vector.broadcast %101 : vector<16x1xf32> to vector<16x32xf32>
    %103 = arith.mulf %98, %102 : vector<16x32xf32>
    %104 = vector.broadcast %20 : vector<1x32xf32> to vector<16x32xf32>
    %105 = arith.mulf %103, %104 : vector<16x32xf32>
    %106 = vector.broadcast %21 : vector<1x32xf32> to vector<16x32xf32>
    %107 = arith.addf %105, %106 : vector<16x32xf32>
    %108 = arith.truncf %107 : vector<16x32xf32> to vector<16x32xbf16>
    %109 = vector.extract_strided_slice %15 {offsets = [0, 128], sizes = [32, 64], strides = [1, 1]} : vector<32x256xbf16> to vector<32x64xbf16>
    %cst_26 = arith.constant dense<0.000000e+00> : vector<16x64xf32>
    %110 = tpu.matmul %108, %109, %cst_26 {dimension_numbers = #tpu.dot_dimension_numbers<[1], [0], [0], [1], [0, 0, 1, 1], [], []>} : vector<16x32xbf16>, vector<32x64xbf16>, vector<16x64xf32> -> vector<16x64xf32>
    %111 = vector.broadcast %18 : vector<1x64xf32> to vector<16x64xf32>
    %112 = arith.addf %110, %111 : vector<16x64xf32>
    %cst_27 = arith.constant 0.000000e+00 : f32
    %113 = vector.broadcast %cst_27 : f32 to vector<16x64xf32>
    %114 = arith.maximumf %112, %113 : vector<16x64xf32>
    %115 = arith.truncf %114 : vector<16x64xf32> to vector<16x64xbf16>
    %116 = vector.extract_strided_slice %15 {offsets = [0, 192], sizes = [32, 64], strides = [1, 1]} : vector<32x256xbf16> to vector<32x64xbf16>
    %cst_28 = arith.constant dense<0.000000e+00> : vector<16x32xf32>
    %117 = tpu.matmul %115, %116, %cst_28 {dimension_numbers = #tpu.dot_dimension_numbers<[1], [1], [0], [0], [0, 0, 1, 0], [], []>} : vector<16x64xbf16>, vector<32x64xbf16>, vector<16x32xf32> -> vector<16x32xf32>
    %118 = vector.broadcast %19 : vector<1x32xf32> to vector<16x32xf32>
    %119 = arith.addf %117, %118 : vector<16x32xf32>
    %120 = arith.addf %12, %119 : vector<16x32xf32>
    %cst_29 = arith.constant dense<0.000000e+00> : vector<16xf32>
    %121 = vector.multi_reduction <add>, %120, %cst_29 [1] : vector<16x32xf32> to vector<16xf32>
    %122 = vector.shape_cast %121 : vector<16xf32> to vector<16x1xf32>
    %cst_30 = arith.constant 3.200000e+01 : f32
    %123 = vector.broadcast %cst_30 : f32 to vector<16x1xf32>
    %124 = arith.divf %122, %123 : vector<16x1xf32>
    %125 = vector.broadcast %124 : vector<16x1xf32> to vector<16x32xf32>
    %126 = arith.subf %120, %125 : vector<16x32xf32>
    %127 = arith.mulf %126, %126 : vector<16x32xf32>
    %cst_31 = arith.constant dense<0.000000e+00> : vector<16xf32>
    %128 = vector.multi_reduction <add>, %127, %cst_31 [1] : vector<16x32xf32> to vector<16xf32>
    %129 = vector.shape_cast %128 : vector<16xf32> to vector<16x1xf32>
    %cst_32 = arith.constant 3.200000e+01 : f32
    %130 = vector.broadcast %cst_32 : f32 to vector<16x1xf32>
    %131 = arith.divf %129, %130 : vector<16x1xf32>
    %132 = vector.broadcast %124 : vector<16x1xf32> to vector<16x32xf32>
    %133 = arith.subf %120, %132 : vector<16x32xf32>
    %cst_33 = arith.constant 9.99999974E-6 : f32
    %134 = vector.broadcast %cst_33 : f32 to vector<16x1xf32>
    %135 = arith.addf %131, %134 : vector<16x1xf32>
    %136 = math.rsqrt %135 : vector<16x1xf32>
    %137 = vector.broadcast %136 : vector<16x1xf32> to vector<16x32xf32>
    %138 = arith.mulf %133, %137 : vector<16x32xf32>
    %139 = vector.broadcast %22 : vector<1x32xf32> to vector<16x32xf32>
    %140 = arith.mulf %138, %139 : vector<16x32xf32>
    %141 = vector.broadcast %23 : vector<1x32xf32> to vector<16x32xf32>
    %142 = arith.addf %140, %141 : vector<16x32xf32>
    %c1 = arith.constant 1 : index
    %c0_34 = arith.constant 0 : index
    %c0_35 = arith.constant 0 : index
    %143 = vector.load %arg4[%c1, %c0_34, %c0_35] : memref<2x32x256xbf16, #tpu.memory_space<vmem>>, vector<1x32x256xbf16>
    %144 = vector.shape_cast %143 : vector<1x32x256xbf16> to vector<32x256xbf16>
    %c1_36 = arith.constant 1 : index
    %c0_37 = arith.constant 0 : index
    %c0_38 = arith.constant 0 : index
    %145 = vector.load %arg5[%c1_36, %c0_37, %c0_38] : memref<2x8x64xf32, #tpu.memory_space<vmem>>, vector<1x8x64xf32>
    %146 = vector.shape_cast %145 : vector<1x8x64xf32> to vector<8x64xf32>
    %147 = vector.extract_strided_slice %146 {offsets = [0, 0], sizes = [1, 64], strides = [1, 1]} : vector<8x64xf32> to vector<1x64xf32>
    %148 = vector.extract_strided_slice %146 {offsets = [1, 0], sizes = [1, 32], strides = [1, 1]} : vector<8x64xf32> to vector<1x32xf32>
    %149 = vector.extract_strided_slice %146 {offsets = [2, 0], sizes = [1, 32], strides = [1, 1]} : vector<8x64xf32> to vector<1x32xf32>
    %150 = vector.extract_strided_slice %146 {offsets = [3, 0], sizes = [1, 32], strides = [1, 1]} : vector<8x64xf32> to vector<1x32xf32>
    %151 = vector.extract_strided_slice %146 {offsets = [4, 0], sizes = [1, 32], strides = [1, 1]} : vector<8x64xf32> to vector<1x32xf32>
    %152 = vector.extract_strided_slice %146 {offsets = [5, 0], sizes = [1, 32], strides = [1, 1]} : vector<8x64xf32> to vector<1x32xf32>
    %153 = arith.truncf %142 : vector<16x32xf32> to vector<16x32xbf16>
    %154 = vector.extract_strided_slice %144 {offsets = [0, 0], sizes = [32, 96], strides = [1, 1]} : vector<32x256xbf16> to vector<32x96xbf16>
    %cst_39 = arith.constant dense<0.000000e+00> : vector<16x96xf32>
    %155 = tpu.matmul %153, %154, %cst_39 {dimension_numbers = #tpu.dot_dimension_numbers<[1], [0], [0], [1], [0, 0, 1, 1], [], []>} : vector<16x32xbf16>, vector<32x96xbf16>, vector<16x96xf32> -> vector<16x96xf32>
    %156 = vector.extract_strided_slice %155 {offsets = [0, 0], sizes = [8, 8], strides = [1, 1]} : vector<16x96xf32> to vector<8x8xf32>
    %157 = vector.extract_strided_slice %155 {offsets = [0, 8], sizes = [8, 8], strides = [1, 1]} : vector<16x96xf32> to vector<8x8xf32>
    %158 = vector.extract_strided_slice %155 {offsets = [0, 16], sizes = [8, 8], strides = [1, 1]} : vector<16x96xf32> to vector<8x8xf32>
    %159 = vector.extract_strided_slice %155 {offsets = [0, 24], sizes = [8, 8], strides = [1, 1]} : vector<16x96xf32> to vector<8x8xf32>
    %160 = vector.extract_strided_slice %155 {offsets = [8, 0], sizes = [8, 8], strides = [1, 1]} : vector<16x96xf32> to vector<8x8xf32>
    %161 = vector.extract_strided_slice %155 {offsets = [8, 8], sizes = [8, 8], strides = [1, 1]} : vector<16x96xf32> to vector<8x8xf32>
    %162 = vector.extract_strided_slice %155 {offsets = [8, 16], sizes = [8, 8], strides = [1, 1]} : vector<16x96xf32> to vector<8x8xf32>
    %163 = vector.extract_strided_slice %155 {offsets = [8, 24], sizes = [8, 8], strides = [1, 1]} : vector<16x96xf32> to vector<8x8xf32>
    %164 = tpu.concatenate %156, %157, %158, %159, %160, %161, %162, %163 in 0 : vector<8x8xf32>, vector<8x8xf32>, vector<8x8xf32>, vector<8x8xf32>, vector<8x8xf32>, vector<8x8xf32>, vector<8x8xf32>, vector<8x8xf32> -> vector<64x8xf32>
    %165 = arith.truncf %164 : vector<64x8xf32> to vector<64x8xbf16>
    %166 = vector.extract_strided_slice %155 {offsets = [0, 32], sizes = [8, 8], strides = [1, 1]} : vector<16x96xf32> to vector<8x8xf32>
    %167 = vector.extract_strided_slice %155 {offsets = [0, 40], sizes = [8, 8], strides = [1, 1]} : vector<16x96xf32> to vector<8x8xf32>
    %168 = vector.extract_strided_slice %155 {offsets = [0, 48], sizes = [8, 8], strides = [1, 1]} : vector<16x96xf32> to vector<8x8xf32>
    %169 = vector.extract_strided_slice %155 {offsets = [0, 56], sizes = [8, 8], strides = [1, 1]} : vector<16x96xf32> to vector<8x8xf32>
    %170 = vector.extract_strided_slice %155 {offsets = [8, 32], sizes = [8, 8], strides = [1, 1]} : vector<16x96xf32> to vector<8x8xf32>
    %171 = vector.extract_strided_slice %155 {offsets = [8, 40], sizes = [8, 8], strides = [1, 1]} : vector<16x96xf32> to vector<8x8xf32>
    %172 = vector.extract_strided_slice %155 {offsets = [8, 48], sizes = [8, 8], strides = [1, 1]} : vector<16x96xf32> to vector<8x8xf32>
    %173 = vector.extract_strided_slice %155 {offsets = [8, 56], sizes = [8, 8], strides = [1, 1]} : vector<16x96xf32> to vector<8x8xf32>
    %174 = tpu.concatenate %166, %167, %168, %169, %170, %171, %172, %173 in 0 : vector<8x8xf32>, vector<8x8xf32>, vector<8x8xf32>, vector<8x8xf32>, vector<8x8xf32>, vector<8x8xf32>, vector<8x8xf32>, vector<8x8xf32> -> vector<64x8xf32>
    %175 = arith.truncf %174 : vector<64x8xf32> to vector<64x8xbf16>
    %176 = vector.extract_strided_slice %155 {offsets = [0, 64], sizes = [8, 8], strides = [1, 1]} : vector<16x96xf32> to vector<8x8xf32>
    %177 = vector.extract_strided_slice %155 {offsets = [0, 72], sizes = [8, 8], strides = [1, 1]} : vector<16x96xf32> to vector<8x8xf32>
    %178 = vector.extract_strided_slice %155 {offsets = [0, 80], sizes = [8, 8], strides = [1, 1]} : vector<16x96xf32> to vector<8x8xf32>
    %179 = vector.extract_strided_slice %155 {offsets = [0, 88], sizes = [8, 8], strides = [1, 1]} : vector<16x96xf32> to vector<8x8xf32>
    %180 = vector.extract_strided_slice %155 {offsets = [8, 64], sizes = [8, 8], strides = [1, 1]} : vector<16x96xf32> to vector<8x8xf32>
    %181 = vector.extract_strided_slice %155 {offsets = [8, 72], sizes = [8, 8], strides = [1, 1]} : vector<16x96xf32> to vector<8x8xf32>
    %182 = vector.extract_strided_slice %155 {offsets = [8, 80], sizes = [8, 8], strides = [1, 1]} : vector<16x96xf32> to vector<8x8xf32>
    %183 = vector.extract_strided_slice %155 {offsets = [8, 88], sizes = [8, 8], strides = [1, 1]} : vector<16x96xf32> to vector<8x8xf32>
    %184 = tpu.concatenate %176, %177, %178, %179, %180, %181, %182, %183 in 0 : vector<8x8xf32>, vector<8x8xf32>, vector<8x8xf32>, vector<8x8xf32>, vector<8x8xf32>, vector<8x8xf32>, vector<8x8xf32>, vector<8x8xf32> -> vector<64x8xf32>
    %185 = arith.truncf %184 : vector<64x8xf32> to vector<64x8xbf16>
    %cst_40 = arith.constant dense<0.000000e+00> : vector<64x64xf32>
    %186 = tpu.matmul %165, %175, %cst_40 {dimension_numbers = #tpu.dot_dimension_numbers<[1], [1], [0], [0], [0, 0, 1, 0], [], []>} : vector<64x8xbf16>, vector<64x8xbf16>, vector<64x64xf32> -> vector<64x64xf32>
    %187 = arith.addf %186, %13 : vector<64x64xf32>
    %cst_41 = arith.constant dense<0xFF800000> : vector<64xf32>
    %188 = vector.multi_reduction <maximumf>, %187, %cst_41 [1] : vector<64x64xf32> to vector<64xf32>
    %189 = vector.shape_cast %188 : vector<64xf32> to vector<64x1xf32>
    %190 = vector.broadcast %189 : vector<64x1xf32> to vector<64x64xf32>
    %191 = arith.subf %187, %190 : vector<64x64xf32>
    %192 = math.exp %191 : vector<64x64xf32>
    %cst_42 = arith.constant dense<0.000000e+00> : vector<64xf32>
    %193 = vector.multi_reduction <add>, %192, %cst_42 [1] : vector<64x64xf32> to vector<64xf32>
    %194 = vector.shape_cast %193 : vector<64xf32> to vector<64x1xf32>
    %195 = tpu.reciprocal %194 {approx = true} : vector<64x1xf32> -> vector<64x1xf32>
    %196 = vector.broadcast %195 : vector<64x1xf32> to vector<64x64xf32>
    %197 = arith.mulf %192, %196 : vector<64x64xf32>
    %198 = arith.truncf %197 : vector<64x64xf32> to vector<64x64xbf16>
    %cst_43 = arith.constant dense<0.000000e+00> : vector<64x8xf32>
    %199 = tpu.matmul %198, %185, %cst_43 {dimension_numbers = #tpu.dot_dimension_numbers<[1], [0], [0], [1], [0, 0, 1, 1], [], []>} : vector<64x64xbf16>, vector<64x8xbf16>, vector<64x8xf32> -> vector<64x8xf32>
    %200 = vector.extract_strided_slice %199 {offsets = [0, 0], sizes = [8, 8], strides = [1, 1]} : vector<64x8xf32> to vector<8x8xf32>
    %201 = vector.extract_strided_slice %199 {offsets = [8, 0], sizes = [8, 8], strides = [1, 1]} : vector<64x8xf32> to vector<8x8xf32>
    %202 = vector.extract_strided_slice %199 {offsets = [16, 0], sizes = [8, 8], strides = [1, 1]} : vector<64x8xf32> to vector<8x8xf32>
    %203 = vector.extract_strided_slice %199 {offsets = [24, 0], sizes = [8, 8], strides = [1, 1]} : vector<64x8xf32> to vector<8x8xf32>
    %204 = tpu.concatenate %200, %201, %202, %203 in 1 : vector<8x8xf32>, vector<8x8xf32>, vector<8x8xf32>, vector<8x8xf32> -> vector<8x32xf32>
    %205 = vector.extract_strided_slice %199 {offsets = [32, 0], sizes = [8, 8], strides = [1, 1]} : vector<64x8xf32> to vector<8x8xf32>
    %206 = vector.extract_strided_slice %199 {offsets = [40, 0], sizes = [8, 8], strides = [1, 1]} : vector<64x8xf32> to vector<8x8xf32>
    %207 = vector.extract_strided_slice %199 {offsets = [48, 0], sizes = [8, 8], strides = [1, 1]} : vector<64x8xf32> to vector<8x8xf32>
    %208 = vector.extract_strided_slice %199 {offsets = [56, 0], sizes = [8, 8], strides = [1, 1]} : vector<64x8xf32> to vector<8x8xf32>
    %209 = tpu.concatenate %205, %206, %207, %208 in 1 : vector<8x8xf32>, vector<8x8xf32>, vector<8x8xf32>, vector<8x8xf32> -> vector<8x32xf32>
    %210 = tpu.concatenate %204, %209 in 0 : vector<8x32xf32>, vector<8x32xf32> -> vector<16x32xf32>
    %211 = arith.truncf %210 : vector<16x32xf32> to vector<16x32xbf16>
    %212 = vector.extract_strided_slice %144 {offsets = [0, 96], sizes = [32, 32], strides = [1, 1]} : vector<32x256xbf16> to vector<32x32xbf16>
    %cst_44 = arith.constant dense<0.000000e+00> : vector<16x32xf32>
    %213 = tpu.matmul %211, %212, %cst_44 {dimension_numbers = #tpu.dot_dimension_numbers<[1], [0], [0], [1], [0, 0, 1, 1], [], []>} : vector<16x32xbf16>, vector<32x32xbf16>, vector<16x32xf32> -> vector<16x32xf32>
    %214 = arith.addf %142, %213 : vector<16x32xf32>
    %cst_45 = arith.constant dense<0.000000e+00> : vector<16xf32>
    %215 = vector.multi_reduction <add>, %214, %cst_45 [1] : vector<16x32xf32> to vector<16xf32>
    %216 = vector.shape_cast %215 : vector<16xf32> to vector<16x1xf32>
    %cst_46 = arith.constant 3.200000e+01 : f32
    %217 = vector.broadcast %cst_46 : f32 to vector<16x1xf32>
    %218 = arith.divf %216, %217 : vector<16x1xf32>
    %219 = vector.broadcast %218 : vector<16x1xf32> to vector<16x32xf32>
    %220 = arith.subf %214, %219 : vector<16x32xf32>
    %221 = arith.mulf %220, %220 : vector<16x32xf32>
    %cst_47 = arith.constant dense<0.000000e+00> : vector<16xf32>
    %222 = vector.multi_reduction <add>, %221, %cst_47 [1] : vector<16x32xf32> to vector<16xf32>
    %223 = vector.shape_cast %222 : vector<16xf32> to vector<16x1xf32>
    %cst_48 = arith.constant 3.200000e+01 : f32
    %224 = vector.broadcast %cst_48 : f32 to vector<16x1xf32>
    %225 = arith.divf %223, %224 : vector<16x1xf32>
    %226 = vector.broadcast %218 : vector<16x1xf32> to vector<16x32xf32>
    %227 = arith.subf %214, %226 : vector<16x32xf32>
    %cst_49 = arith.constant 9.99999974E-6 : f32
    %228 = vector.broadcast %cst_49 : f32 to vector<16x1xf32>
    %229 = arith.addf %225, %228 : vector<16x1xf32>
    %230 = math.rsqrt %229 : vector<16x1xf32>
    %231 = vector.broadcast %230 : vector<16x1xf32> to vector<16x32xf32>
    %232 = arith.mulf %227, %231 : vector<16x32xf32>
    %233 = vector.broadcast %149 : vector<1x32xf32> to vector<16x32xf32>
    %234 = arith.mulf %232, %233 : vector<16x32xf32>
    %235 = vector.broadcast %150 : vector<1x32xf32> to vector<16x32xf32>
    %236 = arith.addf %234, %235 : vector<16x32xf32>
    %237 = arith.truncf %236 : vector<16x32xf32> to vector<16x32xbf16>
    %238 = vector.extract_strided_slice %144 {offsets = [0, 128], sizes = [32, 64], strides = [1, 1]} : vector<32x256xbf16> to vector<32x64xbf16>
    %cst_50 = arith.constant dense<0.000000e+00> : vector<16x64xf32>
    %239 = tpu.matmul %237, %238, %cst_50 {dimension_numbers = #tpu.dot_dimension_numbers<[1], [0], [0], [1], [0, 0, 1, 1], [], []>} : vector<16x32xbf16>, vector<32x64xbf16>, vector<16x64xf32> -> vector<16x64xf32>
    %240 = vector.broadcast %147 : vector<1x64xf32> to vector<16x64xf32>
    %241 = arith.addf %239, %240 : vector<16x64xf32>
    %cst_51 = arith.constant 0.000000e+00 : f32
    %242 = vector.broadcast %cst_51 : f32 to vector<16x64xf32>
    %243 = arith.maximumf %241, %242 : vector<16x64xf32>
    %244 = arith.truncf %243 : vector<16x64xf32> to vector<16x64xbf16>
    %245 = vector.extract_strided_slice %144 {offsets = [0, 192], sizes = [32, 64], strides = [1, 1]} : vector<32x256xbf16> to vector<32x64xbf16>
    %cst_52 = arith.constant dense<0.000000e+00> : vector<16x32xf32>
    %246 = tpu.matmul %244, %245, %cst_52 {dimension_numbers = #tpu.dot_dimension_numbers<[1], [1], [0], [0], [0, 0, 1, 0], [], []>} : vector<16x64xbf16>, vector<32x64xbf16>, vector<16x32xf32> -> vector<16x32xf32>
    %247 = vector.broadcast %148 : vector<1x32xf32> to vector<16x32xf32>
    %248 = arith.addf %246, %247 : vector<16x32xf32>
    %249 = arith.addf %142, %248 : vector<16x32xf32>
    %cst_53 = arith.constant dense<0.000000e+00> : vector<16xf32>
    %250 = vector.multi_reduction <add>, %249, %cst_53 [1] : vector<16x32xf32> to vector<16xf32>
    %251 = vector.shape_cast %250 : vector<16xf32> to vector<16x1xf32>
    %cst_54 = arith.constant 3.200000e+01 : f32
    %252 = vector.broadcast %cst_54 : f32 to vector<16x1xf32>
    %253 = arith.divf %251, %252 : vector<16x1xf32>
    %254 = vector.broadcast %253 : vector<16x1xf32> to vector<16x32xf32>
    %255 = arith.subf %249, %254 : vector<16x32xf32>
    %256 = arith.mulf %255, %255 : vector<16x32xf32>
    %cst_55 = arith.constant dense<0.000000e+00> : vector<16xf32>
    %257 = vector.multi_reduction <add>, %256, %cst_55 [1] : vector<16x32xf32> to vector<16xf32>
    %258 = vector.shape_cast %257 : vector<16xf32> to vector<16x1xf32>
    %cst_56 = arith.constant 3.200000e+01 : f32
    %259 = vector.broadcast %cst_56 : f32 to vector<16x1xf32>
    %260 = arith.divf %258, %259 : vector<16x1xf32>
    %261 = vector.broadcast %253 : vector<16x1xf32> to vector<16x32xf32>
    %262 = arith.subf %249, %261 : vector<16x32xf32>
    %cst_57 = arith.constant 9.99999974E-6 : f32
    %263 = vector.broadcast %cst_57 : f32 to vector<16x1xf32>
    %264 = arith.addf %260, %263 : vector<16x1xf32>
    %265 = math.rsqrt %264 : vector<16x1xf32>
    %266 = vector.broadcast %265 : vector<16x1xf32> to vector<16x32xf32>
    %267 = arith.mulf %262, %266 : vector<16x32xf32>
    %268 = vector.broadcast %151 : vector<1x32xf32> to vector<16x32xf32>
    %269 = arith.mulf %267, %268 : vector<16x32xf32>
    %270 = vector.broadcast %152 : vector<1x32xf32> to vector<16x32xf32>
    %271 = arith.addf %269, %270 : vector<16x32xf32>
    %272 = arith.truncf %271 : vector<16x32xf32> to vector<16x32xbf16>
    %273 = vector.extract_strided_slice %8 {offsets = [0, 32], sizes = [64, 32], strides = [1, 1]} : vector<64x64xbf16> to vector<64x32xbf16>
    %cst_58 = arith.constant dense<0.000000e+00> : vector<16x64xf32>
    %274 = tpu.matmul %272, %273, %cst_58 {dimension_numbers = #tpu.dot_dimension_numbers<[1], [1], [0], [0], [0, 0, 1, 0], [], []>} : vector<16x32xbf16>, vector<64x32xbf16>, vector<16x64xf32> -> vector<16x64xf32>
    %c0_59 = arith.constant 0 : index
    %c0_60 = arith.constant 0 : index
    %275 = vector.load %arg6[%c0_59, %c0_60] : memref<1x64xf32, #tpu.memory_space<vmem>>, vector<1x64xf32>
    %276 = vector.broadcast %275 : vector<1x64xf32> to vector<16x64xf32>
    %277 = arith.addf %274, %276 : vector<16x64xf32>
    %cst_61 = arith.constant dense<0xFF800000> : vector<16xf32>
    %278 = vector.multi_reduction <maximumf>, %277, %cst_61 [1] : vector<16x64xf32> to vector<16xf32>
    %279 = vector.shape_cast %278 : vector<16xf32> to vector<16x1xf32>
    %280 = vector.broadcast %279 : vector<16x1xf32> to vector<16x64xf32>
    %281 = arith.subf %277, %280 : vector<16x64xf32>
    %282 = math.exp %281 : vector<16x64xf32>
    %cst_62 = arith.constant dense<0.000000e+00> : vector<16xf32>
    %283 = vector.multi_reduction <add>, %282, %cst_62 [1] : vector<16x64xf32> to vector<16xf32>
    %284 = vector.shape_cast %283 : vector<16xf32> to vector<16x1xf32>
    %285 = math.log %284 : vector<16x1xf32>
    %286 = arith.addf %279, %285 : vector<16x1xf32>
    %287 = vector.broadcast %286 : vector<16x1xf32> to vector<16x64xf32>
    %288 = arith.subf %277, %287 : vector<16x64xf32>
    %289 = vector.extract_strided_slice %288 {offsets = [0, 0], sizes = [8, 64], strides = [1, 1]} : vector<16x64xf32> to vector<8x64xf32>
    %290 = vector.extract_strided_slice %288 {offsets = [8, 0], sizes = [8, 64], strides = [1, 1]} : vector<16x64xf32> to vector<8x64xf32>
    %291 = tpu.concatenate %289, %290 in 1 : vector<8x64xf32>, vector<8x64xf32> -> vector<8x128xf32>
    %c0_63 = arith.constant 0 : index
    %c0_64 = arith.constant 0 : index
    %292 = vector.load %arg7[%c0_63, %c0_64] : memref<8x128xf32, #tpu.memory_space<vmem>>, vector<8x128xf32>
    tpu.vector_store %arg7[%c0_63, %c0_64], %291 {strides = array<i32>} : memref<8x128xf32, #tpu.memory_space<vmem>>, vector<8x128xf32>,
    return
  }
}

</mosaic_0001>

<bundles_post_ra>
// kernel: my_transformer_pallas.1
= control target key start
LH: loop header
LB: loop body
LE: loop exit
PB: predicated region body
PF: predicated region fallthrough
CT: control target
= control target key end

     0   :  { %12 = vsyncpa [#allocation3], 0  ;;  %s2562_s0 = inlined_call_operand.vmem [shape: s32[16,1], index: 0, kind: input, shape index: {}]   ;;  %s2563_s1 = inlined_call_operand.vmem [shape: f32[16,32], index: 1, kind: input, shape index: {}]   ;;  %s2564_s2 = inlined_call_operand.hbm [shape: f32[64,64], index: 2, kind: input, shape index: {}]   ;;  %s2565_s3 = inlined_call_operand.hbm [shape: bf16[64,64], index: 3, kind: input, shape index: {}]   ;;  %s2566_s4 = inlined_call_operand.hbm [shape: bf16[2,32,256], index: 4, kind: input, shape index: {}]   ;;  %s2567_s5 = inlined_call_operand.hbm [shape: f32[2,8,64], index: 5, kind: input, shape index: {}]   ;;  %s2568_s6 = inlined_call_operand.vmem [shape: f32[1,64], index: 6, kind: input, shape index: {}]   ;;  %s2569_s7 = inlined_call_operand.vmem [shape: f32[8,128], index: 7, kind: output, shape index: {}]  }
   0x1   :  { %13 = vsyncpa [#allocation5], 0 }
   0x2   :  { %14 = vsyncpa [#allocation8], 0  ;;  %s2104_s24 = smov [#allocation4]  }
   0x3   :  { %s36_s25 = sshll.u32 %s2104_s24, 4  ;;  %s37_s25 = int_to_ptr.vmem [resolvable:$true] %s36_s25 }
   0x4   :  { %s2026_s26 = scalar_lea.vmem %s37_s25, 512  ;;  %p2031_p1 = scmp.lt.s32.totalorder %s37_s25, %s37_s25 }
   0x5   :  { %p2027_p0 = scmp.ne.s32.totalorder %s37_s25, %s2026_s26  ;;  %p2032_p2 = scmp.lt.s32.totalorder %s2026_s26, %s2026_s26 }
   0x7   :  { %p2033_p3 = por %p2032_p2, %p2031_p1 }
   0x9   :  { %p2034_p4 = pnand %p2033_p3, %p2027_p0 }
   0xb   :  { %2037 = shalt.err (!%p2034_p4)
}
   0xc   :  { %s2105_s27 = smov 64   ;;  %s2106_s28 = smov 4  }
   0xd   :  { %42 = dma.hbm_to_vmem [thread:$0]  %s2565_s3, 512, %s37_s25, [#allocation5], %s2105_s27, %s2105_s27, %s2106_s28  }
   0xe   :  { %s2107_s8 = smov [#allocation2]  }
   0xf   :  { %s24_s9 = sshll.u32 %s2107_s8, 4  ;;  %s25_s9 = int_to_ptr.vmem [resolvable:$true] %s24_s9 }
  0x10   :  { %s2046_s10 = scalar_lea.vmem %s25_s9, 1024  ;;  %p2051_p6 = scmp.lt.s32.totalorder %s25_s9, %s25_s9 }
  0x11   :  { %p2047_p5 = scmp.ne.s32.totalorder %s25_s9, %s2046_s10  ;;  %p2052_p7 = scmp.lt.s32.totalorder %s2046_s10, %s2046_s10 }
  0x13   :  { %p2053_p8 = por %p2052_p7, %p2051_p6 }
  0x15   :  { %p2054_p9 = pnand %p2053_p8, %p2047_p5 }
  0x17   :  { %2057 = shalt.err (!%p2054_p9)
}
  0x18   :  { %s2108_s11 = smov 128   ;;  %s2109_s12 = smov 8  }
  0x19   :  { %30 = dma.hbm_to_vmem [thread:$0]  %s2564_s2, 1024, %s25_s9, [#allocation3], %s2108_s11, %s2108_s11, %s2109_s12  }
  0x1a   :  { %s2110_s15 = smov [#allocation6]   ;;  %s2111_s3 = smov [#allocation7]  }
  0x1b   :  { %s48_s16 = sshll.u32 %s2110_s15, 4  ;;  %s60_s17 = sshll.u32 %s2111_s3, 4  ;;  %s49_s16 = int_to_ptr.vmem [resolvable:$true] %s48_s16  ;;  %s61_s17 = int_to_ptr.vmem [resolvable:$true] %s60_s17 }
  0x1c   :  { %s2066_s18 = scalar_lea.vmem %s49_s16, 1024  ;;  %p2071_p11 = scmp.lt.s32.totalorder %s49_s16, %s49_s16 }
  0x1d   :  { %p2067_p10 = scmp.ne.s32.totalorder %s49_s16, %s2066_s18  ;;  %p2072_p12 = scmp.lt.s32.totalorder %s2066_s18, %s2066_s18 }
  0x1f   :  { %p2073_p13 = por %p2072_p12, %p2071_p11 }
  0x21   :  { %p2074_p0 = pnand %p2073_p13, %p2067_p10 }
  0x23   :  { %2077 = shalt.err (!%p2074_p0)
}
  0x24   :  { %54 = dma.hbm_to_vmem [thread:$0]  %s2566_s4, 1024, %s49_s16, [#allocation5], %s2108_s11, %s2108_s11, %s2109_s12  }
  0x25   :  { %s2086_s21 = scalar_lea.vmem %s61_s17, 256  ;;  %p2091_p2 = scmp.lt.s32.totalorder %s61_s17, %s61_s17 }
  0x26   :  { %p2087_p1 = scmp.ne.s32.totalorder %s61_s17, %s2086_s21  ;;  %p2092_p3 = scmp.lt.s32.totalorder %s2086_s21, %s2086_s21 }
  0x28   :  { %p2093_p4 = por %p2092_p3, %p2091_p2 }
  0x2a   :  { %p2094_p5 = pnand %p2093_p4, %p2087_p1 }
  0x2c   :  { %2097 = shalt.err (!%p2094_p5)
}
  0x2d   :  { %66 = dma.hbm_to_vmem [thread:$0]  %s2567_s5, 256, %s61_s17, [#allocation8], %s2108_s11, %s2108_s11, %s2109_s12  }
  0x2e   :  { %2098 = dma.done.wait [#allocation3], 1024  }
  0x2f   :  { %2099 = vsyncadd [#allocation3], 4294966272 }
  0x30   :  { %2100 = dma.done.wait [#allocation5], 1536  }
  0x31   :  { %2101 = vsyncadd [#allocation5], 4294965760 }
  0x32   :  { %2102 = dma.done.wait [#allocation8], 256  }
  0x33   :  { %2103 = vsyncadd [#allocation8], 4294967040  ;;  %v2112_v0 = vmov 0   ;;  %v2113_v1 = vmov 0.0   ;;  %v82_v2 = vld [vmem:[%s2562_s0] sm:$0xff]  ;;  %v1910_v3 = vld [vmem:[#allocation4 + $0x18] sm:$0xff]   ;;  %v84_v8 = vlaneseq }
  0x34   :  { %1879 = vset.pattern.permute.xlu0 %v2112_v0  ;;  %1701 = vmatprep.subr.bf16.mxu1 %v2113_v1  ;;  %v83_v4 = vld [vmem:[%s2562_s0 + $0x8] sm:$0xff]  ;;  %v1911_v5 = vld [vmem:[#allocation4 + $0x10] sm:$0xff]   ;;  %vm2114_vm0 = vmmov 0   ;;  %v1913_v7 = vld [vmem:[#allocation4] sm:$0xff]   ;;  %vm131_vm3 = vcmask 523264   ;;  %vm202_vm4 = vcmask 261120  }
  0x35   :  { %87 = vperm.xlu0 %1879, %v82_v2   ;;  %1702 = vmatpush3.bf16.msra.mxu1 %v1910_v3  ;;  %v1912_v6 = vld [vmem:[#allocation4 + $0x8] sm:$0xff]   ;;  %v85_v9 = vand.u32 127, %v84_v8  ;;  %v2198_v15 = vld [vmem:[#allocation6 + $0x10] ss:$8 sps:$4 sm:$0xff]   ;;  %v105_v18 = vld [vmem:[%s2563_s1] sm:$0xff]  ;;  %s2115_s29 = smov 120  }
  0x36   :  { %1703 = vmatprep.subr.bf16.mxu1 %v2113_v1  ;;  %1709 = vmatprep.mubr.msk.bf16.mxu1 %vm2114_vm0, %v2113_v1  ;;  %v2202_v16 = vld [vmem:[#allocation6] ss:$8 sps:$4 sm:$0xff]   ;;  %s2116_s30 = smov 112   ;;  %s2118_s8 = smov 96   ;;  %vm283_vm5 = vcmask 64512   ;;  %v2261_v50 = vld [vmem:[#allocation2 + $0x10] sm:$0xff] }
  0x37   :  { %v106_v20 = vld [vmem:[%s2563_s1 + $0x8] sm:$0xff]  ;;  %s2117_s1 = smov 104   ;;  %v2259_v49 = vld [vmem:[#allocation2] sm:$0xff]  ;;  %v2268_v57 = vld [vmem:[#allocation2 + $0x18] sm:$0xff]  ;;  %s2119_s9 = smov 32   ;;  %vm567_vm6 = vcmask 130048  }
  0x38   :  { %v2264_v54 = vld [vmem:[#allocation2 + $0x8] sm:$0xff]  ;;  %v2271_v61 = vld [vmem:[#allocation2 + $0x20] sm:$0xff]  ;;  %v2276_v2 = vld [vmem:[#allocation2 + $0x30] sm:$0xff]  ;;  %s2120_s10 = smov 16   ;;  %s2121_s11 = smov 24   ;;  %vm569_vm7 = vcmask 195584  }
  0x39   :  { %90 = vperm.xlu0 %1879, %v83_v4   ;;  %1704 = vmatpush3.bf16.msra.mxu1 %v1911_v5 }
  0x3a   :  { %1705 = vmatprep.subr.bf16.mxu1 %v2113_v1 }
  0x3d   :  { %1706 = vmatpush3.bf16.msra.mxu1 %v1912_v6  ;;  %v2279_v6 = vld [vmem:[#allocation2 + $0x28] sm:$0xff] }
  0x3e   :  { %1707 = vmatprep.subr.bf16.mxu1 %v2113_v1 }
  0x41   :  { %1708 = vmatpush3.bf16.msra.mxu1 %v1913_v7 }
  0x42   :  { %1713 = vmatprep.subr.bf16.mxu1 %v2113_v1 }
  0xb0   :  { %v88_v10 = vpop.permute.xlu0 %87 }
  0xb1   :  { %vm92_vm1 = vcmp.eq.s32.totalorder %v85_v9, %v88_v10 }
  0xb2   :  { %v94_v12 = vsel %vm92_vm1, 1.0, %v2113_v1 }
  0xb4   :  { %v91_v11 = vpop.permute.xlu0 %90 }
  0xb5   :  { %vm93_vm2 = vcmp.eq.s32.totalorder %v85_v9, %v91_v11  ;;  %v2284_v11 = vld [vmem:[#allocation2 + $0x38] sm:$0xff] }
  0xb6   :  { %v95_v13 = vsel %vm93_vm2, 1.0, %v2113_v1 }
  0xb7   :  { %v96_v14 = vpack.c.bf16 %v95_v13, %v94_v12 }
  0xb9   :  { %1710 = vmatmul.mubr.msk.bf16.vlgmr.msra.gmra.mxu1 %vm131_vm3, %v96_v14 }
  0xba   :  { %1717 = vmatprep.mubr.msk.bf16.mxu1 %vm2114_vm0, %v2113_v1  ;;  %1714 = vmatpush3.bf16.msra.mxu1 %v2198_v15 }
  0xbb   :  { %1715 = vmatprep.subr.bf16.mxu1 %v2113_v1 }
  0xbe   :  { %1716 = vmatpush3.bf16.msra.mxu1 %v2202_v16 }
 0x179   :  { %v169_v17 = vpop.f32.mrf.mxu1 }
 0x17a   :  { %v2211_v22 = vadd.f32 %v169_v17, %v105_v18 }
 0x17b   :  { %v1711_v19 = vpop.f32.mrf.mxu1 }
 0x17d   :  { %v172_v21 = vpop.f32.mrf.mxu1 }
 0x17e   :  { %v2213_v23 = vadd.f32 %v172_v21, %v106_v20 }
 0x17f   :  { %v1712_v24 = vpop.f32.mrf.mxu1 }
 0x180   :  { %v189_v25 = vpack.c.bf16 %v2213_v23, %v2211_v22 }
 0x182   :  { %1718 = vmatmul.mubr.msk.bf16.vlgmr.msra.gmra.mxu1 %vm202_vm4, %v189_v25 }
 0x242   :  { %v240_v26 = vpop.f32.mrf.mxu1 }
 0x244   :  { %v1719_v27 = vpop.f32.mrf.mxu1 }
 0x246   :  { %v243_v28 = vpop.f32.mrf.mxu1 }
 0x247   :  { %258 = vrot.lane.b32.xlu0 %v243_v28, %s2115_s29  ;;  %261 = vrot.lane.b32.xlu1 %v243_v28, %s2116_s30 }
 0x248   :  { %v1720_v29 = vpop.f32.mrf.mxu1 }
 0x24b   :  { %254 = vrot.lane.b32.xlu0 %v240_v26, %s2117_s1  ;;  %264 = vrot.lane.b32.xlu1 %v243_v28, %s2117_s1 }
 0x24f   :  { %251 = vrot.lane.b32.xlu1 %v240_v26, %s2116_s30 }
 0x253   :  { %248 = vrot.lane.b32.xlu1 %v240_v26, %s2115_s29 }
 0x2b9   :  { %v259_v30 = vpop.permute.xlu0 %258  ;;  %v262_v31 = vpop.permute.xlu1 %261 }
 0x2ba   :  { %v2224_v32 = vpack.c.bf16 %v259_v30, %v243_v28 }
 0x2bc   :  { %279 = vrot.lane.b32.xlu1 %v2224_v32, %s2118_s8 }
 0x2bd   :  { %v265_v33 = vpop.permute.xlu1 %264  ;;  %v255_v35 = vpop.permute.xlu0 %254 }
 0x2be   :  { %v2228_v34 = vpack.c.bf16 %v265_v33, %v262_v31 }
 0x2c0   :  { %281 = vrot.lane.b32.xlu0 %v2228_v34, %s2118_s8 }
 0x2c1   :  { %v252_v36 = vpop.permute.xlu1 %251 }
 0x2c2   :  { %v2232_v37 = vpack.c.bf16 %v255_v35, %v252_v36 }
 0x2c4   :  { %277 = vrot.lane.b32.xlu0 %v2232_v37, %s2118_s8 }
 0x2c5   :  { %v249_v38 = vpop.permute.xlu1 %248 }
 0x2c6   :  { %v2236_v39 = vpack.c.bf16 %v249_v38, %v240_v26 }
 0x2c8   :  { %275 = vrot.lane.b32.xlu1 %v2236_v39, %s2118_s8  ;;  %1729 = vmatprep.mubr.msk.bf16.mxu1 %vm283_vm5, %v2236_v39 }
 0x32e   :  { %v280_v42 = vpop.permute.xlu1 %279 }
 0x32f   :  { %v303_v43 = vsel %vm283_vm5, %v280_v42, 0 }
 0x332   :  { %v282_v40 = vpop.permute.xlu0 %281 }
 0x333   :  { %v306_v41 = vsel %vm283_vm5, %v282_v40, 0  ;;  %1853 = vmatprep.subr.msk.bf16.mxu1 %vm283_vm5, %v282_v40 }
 0x334   :  { %1722 = vmatpush3.bf16.xpose.msra.mxu1 %v306_v41 }
 0x335   :  { %1854 = vmatprep.subr.msk.bf16.mxu1 %vm283_vm5, %v280_v42 }
 0x336   :  { %v278_v44 = vpop.permute.xlu0 %277 }
 0x337   :  { %v300_v45 = vsel %vm283_vm5, %v278_v44, 0 }
 0x33a   :  { %v276_v46 = vpop.permute.xlu1 %275 }
 0x33b   :  { %v297_v47 = vsel %vm283_vm5, %v276_v46, 0 }
 0x33c   :  { %1724 = vmatpush3.bf16.xpose.msra.mxu1 %v303_v43 }
 0x33d   :  { %1855 = vmatprep.subr.msk.bf16.mxu1 %vm283_vm5, %v278_v44 }
 0x344   :  { %1726 = vmatpush3.bf16.xpose.msra.mxu1 %v300_v45 }
 0x345   :  { %1856 = vmatprep.subr.msk.bf16.mxu1 %vm283_vm5, %v276_v46 }
 0x34c   :  { %1728 = vmatpush3.bf16.xpose.msra.mxu1 %v297_v47 }
 0x34d   :  { %1769 = vmatprep.subr.bf16.mxu1 %v2113_v1 }
 0x353   :  { %1730 = vmatmul.mubr.msk.bf16.vlgmr.msra.gmra.mxu1 %vm283_vm5, %v2232_v37 }
 0x354   :  { %1733 = vmatprep.mubr.msk.bf16.mxu1 %vm283_vm5, %v2224_v32 }
 0x35b   :  { %1734 = vmatmul.mubr.msk.bf16.gmra.mxu1 %vm283_vm5, %v2228_v34 }
 0x35c   :  { %1773 = vmatprep.mubr.msk.bf16.mxu1 %vm2114_vm0, %v2113_v1 }
 0x413   :  { %v1731_v48 = vpop.f32.mrf.mxu1 }
 0x414   :  { %v351_v55 = vadd.f32 %v1731_v48, %v2261_v50 }
 0x415   :  { %v342_v51 = vpop.f32.mrf.mxu1 }
 0x416   :  { %v343_v52 = vadd.f32 %v342_v51, %v2259_v49  ;;  %v379_v0 = vsel %vm131_vm3, %v351_v55, -inf }
 0x417   :  { %v1732_v53 = vpop.f32.mrf.mxu1 }
 0x418   :  { %v373_v56 = vsel %vm131_vm3, %v343_v52, -inf  ;;  %v354_v62 = vadd.f32 %v1732_v53, %v2268_v57 }
 0x419   :  { %v345_v58 = vpop.f32.mrf.mxu1  ;;  %374 = vmax.xlane.f32.xlu0 %v373_v56 }
 0x41a   :  { %v346_v59 = vadd.f32 %v345_v58, %v2264_v54  ;;  %v382_v10 = vsel %vm131_vm3, %v354_v62, -inf }
 0x41b   :  { %v1735_v60 = vpop.f32.mrf.mxu1 }
 0x41c   :  { %v376_v63 = vsel %vm131_vm3, %v346_v59, -inf  ;;  %v367_v7 = vadd.f32 %v1735_v60, %v2276_v2 }
 0x41d   :  { %v358_v3 = vpop.f32.mrf.mxu1  ;;  %377 = vmax.xlane.f32.xlu1 %v376_v63  ;;  %380 = vmax.xlane.f32.xlu0 %v379_v0 }
 0x41e   :  { %v359_v4 = vadd.f32 %v358_v3, %v2271_v61  ;;  %v391_v17 = vsel %vm131_vm3, %v367_v7, -inf }
 0x41f   :  { %v1736_v5 = vpop.f32.mrf.mxu1 }
 0x420   :  { %v385_v9 = vsel %vm131_vm3, %v359_v4, -inf  ;;  %v370_v14 = vadd.f32 %v1736_v5, %v2284_v11 }
 0x421   :  { %v361_v12 = vpop.f32.mrf.mxu1  ;;  %386 = vmax.xlane.f32.xlu1 %v385_v9  ;;  %383 = vmax.xlane.f32.xlu0 %v382_v10 }
 0x422   :  { %v362_v13 = vadd.f32 %v361_v12, %v2279_v6  ;;  %v394_v19 = vsel %vm131_vm3, %v370_v14, -inf }
 0x424   :  { %v388_v18 = vsel %vm131_vm3, %v362_v13, -inf }
 0x425   :  { %392 = vmax.xlane.f32.xlu1 %v391_v17  ;;  %389 = vmax.xlane.f32.xlu0 %v388_v18 }
 0x429   :  { %395 = vmax.xlane.f32.xlu0 %v394_v19 }
 0x436   :  { %471 = vrot.lane.b32.xlu1 %v2228_v34, %s2105_s27 }
 0x4a2   :  { %v375_v20 = vpop.xlane.xlu0 %374 }
 0x4a3   :  { %v397_v21 = vsub.f32 %v343_v52, %v375_v20 }
 0x4a5   :  { %v405_v28 = vmul.f32 1.442695, %v397_v21 }
 0x4a6   :  { %v378_v24 = vpop.xlane.xlu1 %377  ;;  %v381_v25 = vpop.xlane.xlu0 %380 }
 0x4a7   :  { %v399_v26 = vsub.f32 %v351_v55, %v381_v25  ;;  %v398_v29 = vsub.f32 %v346_v59, %v378_v24 }
 0x4a9   :  { %v409_v27 = vmul.f32 1.442695, %v399_v26  ;;  %v407_v36 = vmul.f32 1.442695, %v398_v29 }
 0x4aa   :  { %v387_v30 = vpop.xlane.xlu1 %386  ;;  %v384_v31 = vpop.xlane.xlu0 %383 }
 0x4ab   :  { %v400_v33 = vsub.f32 %v354_v62, %v384_v31  ;;  %1926 = vpow2.f32 %v409_v27  ;;  %v401_v38 = vsub.f32 %v359_v4, %v387_v30 }
 0x4ac   :  { %1928 = vpow2.f32 %v405_v28 }
 0x4ad   :  { %v411_v35 = vmul.f32 1.442695, %v400_v33  ;;  %v413_v43 = vmul.f32 1.442695, %v401_v38 }
 0x4ae   :  { %v393_v40 = vpop.xlane.xlu1 %392  ;;  %v390_v41 = vpop.xlane.xlu0 %389 }
 0x4af   :  { %v403_v42 = vsub.f32 %v367_v7, %v393_v40  ;;  %1930 = vpow2.f32 %v411_v35  ;;  %v402_v44 = vsub.f32 %v362_v13, %v390_v41 }
 0x4b0   :  { %1932 = vpow2.f32 %v407_v36 }
 0x4b1   :  { %v417_v34 = vmul.f32 1.442695, %v403_v42  ;;  %v415_v51 = vmul.f32 1.442695, %v402_v44 }
 0x4b2   :  { %v472_v45 = vpop.permute.xlu1 %471  ;;  %v396_v46 = vpop.xlane.xlu0 %395 }
 0x4b3   :  { %1934 = vpow2.f32 %v417_v34  ;;  %v404_v47 = vsub.f32 %v370_v14, %v396_v46  ;;  %1737 = vmatprep.subr.bf16.mxu0 %v472_v45 }
 0x4b4   :  { %1738 = vmatpush3.bf16.msra.mxu0 %v472_v45  ;;  %1936 = vpow2.f32 %v413_v43 }
 0x4b5   :  { %v419_v48 = vmul.f32 1.442695, %v404_v47 }
 0x4b7   :  { %1938 = vpow2.f32 %v419_v48 }
 0x4b8   :  { %v1927_v52 = vpop.eup %1926  ;;  %1940 = vpow2.f32 %v415_v51 }
 0x4b9   :  { %v427_v53 = vsel %vm131_vm3, %v1927_v52, 0.0  ;;  %v1929_v55 = vpop.eup %1928 }
 0x4ba   :  { %428 = vadd.xlane.f32.xlu1 %v427_v53  ;;  %v421_v58 = vsel %vm131_vm3, %v1929_v55, 0.0 }
 0x4bc   :  { %v1931_v56 = vpop.eup %1930 }
 0x4bd   :  { %v430_v59 = vsel %vm131_vm3, %v1931_v56, 0.0  ;;  %v1933_v60 = vpop.eup %1932 }
 0x4be   :  { %422 = vadd.xlane.f32.xlu1 %v421_v58  ;;  %431 = vadd.xlane.f32.xlu0 %v430_v59  ;;  %v424_v0 = vsel %vm131_vm3, %v1933_v60, 0.0 }
 0x4c0   :  { %v2296_v62 = vpop.eup %1934 }
 0x4c1   :  { %v439_v63 = vsel %vm131_vm3, %v2296_v62, 0.0  ;;  %v1937_v3 = vpop.eup %1936 }
 0x4c2   :  { %440 = vadd.xlane.f32.xlu1 %v439_v63  ;;  %425 = vadd.xlane.f32.xlu0 %v424_v0  ;;  %v433_v7 = vsel %vm131_vm3, %v1937_v3, 0.0 }
 0x4c4   :  { %v1939_v4 = vpop.eup %1938 }
 0x4c5   :  { %v442_v5 = vsel %vm131_vm3, %v1939_v4, 0.0  ;;  %v1941_v9 = vpop.eup %1940 }
 0x4c6   :  { %434 = vadd.xlane.f32.xlu1 %v433_v7  ;;  %443 = vadd.xlane.f32.xlu0 %v442_v5  ;;  %v436_v10 = vsel %vm131_vm3, %v1941_v9, 0.0 }
 0x4ca   :  { %437 = vadd.xlane.f32.xlu0 %v436_v10 }
 0x4d7   :  { %467 = vrot.lane.b32.xlu1 %v2232_v37, %s2105_s27 }
 0x4db   :  { %465 = vrot.lane.b32.xlu1 %v2236_v39, %s2105_s27 }
 0x4e0   :  { %469 = vrot.lane.b32.xlu0 %v2224_v32, %s2105_s27 }
 0x4e4   :  { %589 = vrot.lane.b32.xlu0 %v2198_v15, %s2119_s9 }
 0x543   :  { %v429_v12 = vpop.xlane.xlu1 %428 }
 0x547   :  { %v423_v13 = vpop.xlane.xlu1 %422  ;;  %v432_v14 = vpop.xlane.xlu0 %431 }
 0x548   :  { %1942 = vrcp.f32 %v423_v13 }
 0x54b   :  { %v441_v17 = vpop.xlane.xlu1 %440  ;;  %v426_v18 = vpop.xlane.xlu0 %425 }
 0x54c   :  { %1944 = vrcp.f32 %v426_v18 }
 0x54d   :  { %1946 = vrcp.f32 %v432_v14 }
 0x54e   :  { %1948 = vrcp.f32 %v429_v12 }
 0x54f   :  { %v435_v19 = vpop.xlane.xlu1 %434  ;;  %v444_v20 = vpop.xlane.xlu0 %443 }
 0x550   :  { %1950 = vrcp.f32 %v435_v19 }
 0x553   :  { %v438_v21 = vpop.xlane.xlu0 %437  ;;  %v468_v37 = vpop.permute.xlu1 %467 }
 0x554   :  { %1952 = vrcp.f32 %v438_v21 }
 0x555   :  { %1954 = vrcp.f32 %v444_v20  ;;  %v1943_v24 = vpop.eup %1942 }
 0x556   :  { %1956 = vrcp.f32 %v441_v17  ;;  %v453_v26 = vmul.f32 %v1943_v24, %v1929_v55 }
 0x557   :  { %v470_v39 = vpop.permute.xlu0 %469  ;;  %v466_v29 = vpop.permute.xlu1 %465 }
 0x558   :  { %1739 = vmatprep.subr.bf16.mxu0 %v470_v39 }
 0x559   :  { %1740 = vmatpush3.bf16.msra.mxu0 %v470_v39  ;;  %v1945_v32 = vpop.eup %1944 }
 0x55a   :  { %1741 = vmatprep.subr.bf16.mxu0 %v468_v37  ;;  %v1947_v25 = vpop.eup %1946  ;;  %v454_v27 = vmul.f32 %v1945_v32, %v1933_v60 }
 0x55b   :  { %v1949_v28 = vpop.eup %1948  ;;  %v456_v31 = vmul.f32 %v1947_v25, %v1931_v56  ;;  %v590_v47 = vpop.permute.xlu0 %589 }
 0x55c   :  { %v461_v30 = vpack.c.bf16 %v454_v27, %v453_v26  ;;  %v455_v35 = vmul.f32 %v1949_v28, %v1927_v52 }
 0x55d   :  { %1742 = vmatpush3.bf16.msra.mxu0 %v468_v37  ;;  %v1951_v33 = vpop.eup %1950 }
 0x55e   :  { %1743 = vmatprep.subr.bf16.mxu0 %v466_v29  ;;  %1745 = vmatprep.mubr.msk.bf16.mxu0 %vm131_vm3, %v461_v30  ;;  %v462_v38 = vpack.c.bf16 %v456_v31, %v455_v35  ;;  %v457_v40 = vmul.f32 %v1951_v33, %v1937_v3 }
 0x561   :  { %v1953_v36 = vpop.eup %1952  ;;  %1744 = vmatpush3.bf16.msra.mxu0 %v466_v29 }
 0x562   :  { %v458_v41 = vmul.f32 %v1953_v36, %v1941_v9  ;;  %1753 = vmatprep.subr.bf16.mxu0 %v2113_v1  ;;  %v1955_v42 = vpop.eup %1954 }
 0x563   :  { %v1957_v43 = vpop.eup %1956  ;;  %v460_v44 = vmul.f32 %v1955_v42, %v1939_v4 }
 0x564   :  { %1746 = vmatmul.mubr.msk.bf16.vlgmr.msra.gmra.mxu0 %vm131_vm3, %v462_v38  ;;  %v463_v34 = vpack.c.bf16 %v458_v41, %v457_v40  ;;  %v459_v45 = vmul.f32 %v1957_v43, %v2296_v62  ;;  %v1919_v43 = vld [vmem:[#allocation6 + $0x4] ss:$8 sps:$4 sm:$0xff]  }
 0x565   :  { %1754 = vmatpush3.bf16.msra.mxu0 %v590_v47 }
 0x566   :  { %1749 = vmatprep.mubr.msk.bf16.mxu0 %vm131_vm3, %v463_v34  ;;  %v464_v46 = vpack.c.bf16 %v460_v44, %v459_v45  ;;  %1755 = vmatprep.subr.bf16.mxu0 %v2113_v1  ;;  %v1918_v34 = vld [vmem:[#allocation6 + $0x14] ss:$8 sps:$4 sm:$0xff]  }
 0x56c   :  { %1750 = vmatmul.mubr.msk.bf16.gmra.mxu0 %vm131_vm3, %v464_v46 }
 0x56d   :  { %1757 = vmatprep.mubr.msk.bf16.mxu0 %vm2114_vm0, %v2113_v1 }
 0x624   :  { %v1747_v48 = vpop.f32.mrf.mxu0 }
 0x626   :  { %v523_v51 = vpop.f32.mrf.mxu0 }
 0x628   :  { %v1748_v52 = vpop.f32.mrf.mxu0 }
 0x62a   :  { %v526_v53 = vpop.f32.mrf.mxu0 }
 0x62c   :  { %v1751_v55 = vpop.f32.mrf.mxu0 }
 0x62d   :  { %v1880_v56 = vpack.i.bf16 %v1751_v55, %v1747_v48 }
 0x62e   :  { %v539_v58 = vpop.f32.mrf.mxu0 }
 0x62f   :  { %1881 = vrot.lane.b32.xlu0 %v1880_v56, %s2120_s10 }
 0x630   :  { %v1752_v59 = vpop.f32.mrf.mxu0 }
 0x631   :  { %v1890_v15 = vpack.i.bf16 %v1752_v59, %v1748_v52  ;;  %v2347_v52 = vshrl.u32 %v84_v8, 7 }
 0x632   :  { %v542_v60 = vpop.f32.mrf.mxu0 }
 0x633   :  { %v1885_v62 = vpack.i.bf16 %v542_v60, %v526_v53  ;;  %587 = vrot.lane.b32.xlu0 %v2202_v16, %s2119_s9  ;;  %v668_v56 = vsub.s32 2, %v2347_v52 }
 0x635   :  { %1886 = vrot.lane.b32.xlu1 %v1885_v62, %s2109_s12 }
 0x639   :  { %1891 = vrot.lane.b32.xlu1 %v1890_v15, %s2121_s11  ;;  %v674_v15 = vsub.s32 3, %v2347_v52 }
 0x6a1   :  { %v1882_v63 = vpop.permute.xlu0 %1881 }
 0x6a2   :  { %v1884_v16 = vunpack.i.h.bf16 %v1882_v63  ;;  %v1883_v10 = vunpack.i.l.bf16 %v1882_v63 }
 0x6a5   :  { %v588_v0 = vpop.permute.xlu0 %587 }
 0x6a6   :  { %1756 = vmatpush3.bf16.msra.mxu0 %v588_v0 }
 0x6a7   :  { %v1887_v3 = vpop.permute.xlu1 %1886  ;;  %1761 = vmatprep.subr.bf16.mxu0 %v2113_v1 }
 0x6a8   :  { %v1889_v4 = vunpack.i.h.bf16 %v1887_v3  ;;  %v1888_v5 = vunpack.i.l.bf16 %v1887_v3 }
 0x6aa   :  { %v583_v7 = vsel %vm283_vm5, %v539_v58, %v1889_v4  ;;  %v566_v9 = vsel %vm283_vm5, %v523_v51, %v1888_v5  ;;  %v2352_v58 = vld [vmem:[#allocation7] sm:$0xff] }
 0x6ab   :  { %v1892_v12 = vpop.permute.xlu1 %1891  ;;  %v568_v17 = vsel %vm567_vm6, %v566_v9, %v1883_v10  ;;  %v584_v18 = vsel %vm567_vm6, %v583_v7, %v1884_v16  ;;  %v669_v62 = vrot.slane %v2352_v58, %v668_v56  ;;  %v675_v3 = vrot.slane %v2352_v58, %v674_v15 }
 0x6ac   :  { %v1894_v13 = vunpack.i.h.bf16 %v1892_v12  ;;  %v1893_v14 = vunpack.i.l.bf16 %v1892_v12  ;;  %v681_v12 = vsub.s32 0, %v2347_v52 }
 0x6ae   :  { %v570_v19 = vsel %vm569_vm7, %v568_v17, %v1893_v14  ;;  %v585_v20 = vsel %vm569_vm7, %v584_v18, %v1894_v13  ;;  %v682_v13 = vrot.slane %v2352_v58, %v681_v12 }
 0x6af   :  { %v586_v21 = vpack.c.bf16 %v585_v20, %v570_v19 }
 0x6b1   :  { %1758 = vmatmul.mubr.msk.bf16.vlgmr.msra.gmra.mxu0 %vm202_vm4, %v586_v21 }
 0x6b2   :  { %1765 = vmatprep.mubr.msk.bf16.mxu0 %vm2114_vm0, %v2113_v1  ;;  %1762 = vmatpush3.bf16.msra.mxu0 %v1918_v34 }
 0x6b3   :  { %1763 = vmatprep.subr.bf16.mxu0 %v2113_v1 }
 0x6b6   :  { %1764 = vmatpush3.bf16.msra.mxu0 %v1919_v43 }
 0x6b7   :  { %1777 = vmatprep.subr.bf16.mxu0 %v2113_v1 }
 0x771   :  { %v630_v37 = vpop.f32.mrf.mxu0 }
 0x772   :  { %v637_v39 = vadd.f32 %v630_v37, %v2211_v22 }
 0x773   :  { %v1759_v24 = vpop.f32.mrf.mxu0 }
 0x774   :  { %v639_v32 = vsel %vm202_vm4, %v637_v39, 0.0 }
 0x775   :  { %640 = vadd.xlane.f32.xlu1 %v639_v32  ;;  %v633_v25 = vpop.f32.mrf.mxu0  ;;  %v740_v32 = vsub.s32 1, %v2347_v52 }
 0x776   :  { %v638_v26 = vadd.f32 %v633_v25, %v2213_v23 }
 0x777   :  { %v1760_v27 = vpop.f32.mrf.mxu0  ;;  %v741_v25 = vrot.slane %v2352_v58, %v740_v32 }
 0x778   :  { %v642_v28 = vsel %vm202_vm4, %v638_v26, 0.0 }
 0x779   :  { %643 = vadd.xlane.f32.xlu0 %v642_v28 }
 0x7fe   :  { %v641_v29 = vpop.xlane.xlu1 %640 }
 0x7ff   :  { %v646_v30 = vmul.f32 0.03125, %v641_v29 }
 0x801   :  { %v648_v31 = vsub.f32 %v637_v39, %v646_v30 }
 0x802   :  { %v644_v33 = vpop.xlane.xlu0 %643 }
 0x803   :  { %v647_v35 = vmul.f32 0.03125, %v644_v33  ;;  %v650_v36 = vmul.f32 %v648_v31, %v648_v31 }
 0x805   :  { %v649_v38 = vsub.f32 %v638_v26, %v647_v35  ;;  %v652_v40 = vsel %vm202_vm4, %v650_v36, 0.0 }
 0x806   :  { %653 = vadd.xlane.f32.xlu0 %v652_v40 }
 0x807   :  { %v651_v41 = vmul.f32 %v649_v38, %v649_v38 }
 0x809   :  { %v655_v42 = vsel %vm202_vm4, %v651_v41, 0.0 }
 0x80a   :  { %656 = vadd.xlane.f32.xlu1 %v655_v42 }
 0x81b   :  { %742 = vrot.lane.b32.xlu1 %v1919_v43, %s2105_s27 }
 0x81c   :  { %744 = vrot.lane.b32.xlu0 %v1918_v34, %s2105_s27 }
 0x88f   :  { %v654_v44 = vpop.xlane.xlu0 %653 }
 0x890   :  { %v658_v45 = vmul.f32 0.03125, %v654_v44 }
 0x892   :  { %v660_v46 = vadd.f32 1e-05, %v658_v45 }
 0x893   :  { %v657_v47 = vpop.xlane.xlu1 %656  ;;  %v745_v53 = vpop.permute.xlu0 %744 }
 0x894   :  { %1958 = vrsqrt.f32 %v660_v46  ;;  %v659_v48 = vmul.f32 0.03125, %v657_v47  ;;  %v753_v55 = vsel %vm131_vm3, %v745_v53, 0 }
 0x895   :  { %1770 = vmatpush3.bf16.xpose.msra.mxu1 %v753_v55 }
 0x896   :  { %v661_v51 = vadd.f32 1e-05, %v659_v48  ;;  %1771 = vmatprep.subr.bf16.mxu1 %v2113_v1  ;;  %v2380_v48 = vld [vmem:[#allocation6 + $0x30] ss:$8 sps:$4 sm:$0xff]  }
 0x897   :  { %v743_v16 = vpop.permute.xlu1 %742 }
 0x898   :  { %1960 = vrsqrt.f32 %v661_v51  ;;  %v750_v10 = vsel %vm131_vm3, %v743_v16, 0 }
 0x89d   :  { %1772 = vmatpush3.bf16.xpose.msra.mxu1 %v750_v10 }
 0x8a1   :  { %v1959_v59 = vpop.eup %1958 }
 0x8a2   :  { %v664_v60 = vmul.f32 %v1959_v59, %v648_v31 }
 0x8a4   :  { %v670_v0 = vmul.f32 %v669_v62, %v664_v60 }
 0x8a5   :  { %v1961_v8 = vpop.eup %1960 }
 0x8a6   :  { %v665_v63 = vmul.f32 %v1961_v8, %v649_v38  ;;  %v676_v5 = vadd.f32 %v675_v3, %v670_v0  ;;  %v826_v8 = vsub.s32 4, %v2347_v52 }
 0x8a8   :  { %v671_v4 = vmul.f32 %v669_v62, %v665_v63  ;;  %v827_v0 = vrot.slane %v2352_v58, %v826_v8 }
 0x8aa   :  { %v677_v7 = vadd.f32 %v675_v3, %v671_v4  ;;  %v832_v4 = vsub.s32 5, %v2347_v52 }
 0x8ac   :  { %v678_v9 = vpack.c.bf16 %v677_v7, %v676_v5  ;;  %v833_v16 = vrot.slane %v2352_v58, %v832_v4 }
 0x8ae   :  { %1766 = vmatmul.mubr.msk.bf16.vlgmr.msra.gmra.mxu0 %vm202_vm4, %v678_v9 }
 0x8af   :  { %1781 = vmatprep.mubr.msk.bf16.mxu0 %vm2114_vm0, %v2113_v1  ;;  %1778 = vmatpush3.bf16.msra.mxu0 %v2380_v48 }
 0x8b0   :  { %1779 = vmatprep.subr.bf16.mxu0 %v2113_v1 }
 0x96e   :  { %v728_v14 = vpop.f32.mrf.mxu0 }
 0x96f   :  { %v729_v18 = vadd.f32 %v728_v14, %v682_v13 }
 0x970   :  { %v1767_v17 = vpop.f32.mrf.mxu0 }
 0x971   :  { %v735_v37 = vmax.f32 %v729_v18, 0.0 }
 0x972   :  { %v731_v19 = vpop.f32.mrf.mxu0 }
 0x973   :  { %v732_v20 = vadd.f32 %v731_v19, %v682_v13 }
 0x974   :  { %v1768_v21 = vpop.f32.mrf.mxu0 }
 0x975   :  { %v736_v39 = vmax.f32 %v732_v20, 0.0 }
 0x977   :  { %v737_v24 = vpack.c.bf16 %v736_v39, %v735_v37 }
 0x979   :  { %1774 = vmatmul.mubr.msk.bf16.vlgmr.msra.gmra.mxu1 %vm131_vm3, %v737_v24 }
 0xa39   :  { %v789_v26 = vpop.f32.mrf.mxu1 }
 0xa3a   :  { %v790_v27 = vadd.f32 %v789_v26, %v741_v25 }
 0xa3b   :  { %v1775_v28 = vpop.f32.mrf.mxu1 }
 0xa3c   :  { %v796_v29 = vadd.f32 %v790_v27, %v2211_v22 }
 0xa3d   :  { %v792_v30 = vpop.f32.mrf.mxu1 }
 0xa3e   :  { %v793_v31 = vadd.f32 %v792_v30, %v741_v25  ;;  %v798_v33 = vsel %vm202_vm4, %v796_v29, 0.0 }
 0xa3f   :  { %799 = vadd.xlane.f32.xlu1 %v798_v33  ;;  %v1776_v35 = vpop.f32.mrf.mxu1 }
 0xa40   :  { %v797_v36 = vadd.f32 %v793_v31, %v2213_v23  ;;  %v2383_v23 = vld [vmem:[#allocation6 + $0x20] ss:$8 sps:$4 sm:$0xff]  }
 0xa41   :  { %1780 = vmatpush3.bf16.msra.mxu0 %v2383_v23 }
 0xa42   :  { %v801_v38 = vsel %vm202_vm4, %v797_v36, 0.0 }
 0xa43   :  { %802 = vadd.xlane.f32.xlu0 %v801_v38 }
 0xac8   :  { %v800_v40 = vpop.xlane.xlu1 %799 }
 0xac9   :  { %v804_v41 = vmul.f32 0.03125, %v800_v40 }
 0xacb   :  { %v806_v42 = vsub.f32 %v796_v29, %v804_v41 }
 0xacc   :  { %v803_v34 = vpop.xlane.xlu0 %802 }
 0xacd   :  { %v805_v43 = vmul.f32 0.03125, %v803_v34  ;;  %v808_v44 = vmul.f32 %v806_v42, %v806_v42 }
 0xacf   :  { %v807_v45 = vsub.f32 %v797_v36, %v805_v43  ;;  %v810_v22 = vsel %vm202_vm4, %v808_v44, 0.0 }
 0xad0   :  { %811 = vadd.xlane.f32.xlu0 %v810_v22 }
 0xad1   :  { %v809_v46 = vmul.f32 %v807_v45, %v807_v45 }
 0xad3   :  { %v813_v47 = vsel %vm202_vm4, %v809_v46, 0.0 }
 0xad4   :  { %814 = vadd.xlane.f32.xlu1 %v813_v47 }
 0xb59   :  { %v812_v51 = vpop.xlane.xlu0 %811 }
 0xb5a   :  { %v816_v53 = vmul.f32 0.03125, %v812_v51 }
 0xb5c   :  { %v818_v55 = vadd.f32 1e-05, %v816_v53 }
 0xb5d   :  { %v815_v59 = vpop.xlane.xlu1 %814 }
 0xb5e   :  { %1962 = vrsqrt.f32 %v818_v55  ;;  %v817_v60 = vmul.f32 0.03125, %v815_v59 }
 0xb60   :  { %v819_v62 = vadd.f32 1e-05, %v817_v60 }
 0xb62   :  { %1964 = vrsqrt.f32 %v819_v62 }
 0xb6b   :  { %v1963_v63 = vpop.eup %1962 }
 0xb6c   :  { %v822_v3 = vmul.f32 %v1963_v63, %v806_v42 }
 0xb6e   :  { %v828_v7 = vmul.f32 %v827_v0, %v822_v3 }
 0xb6f   :  { %v1965_v5 = vpop.eup %1964 }
 0xb70   :  { %v823_v9 = vmul.f32 %v1965_v5, %v807_v45  ;;  %v2395_v13 = vadd.f32 %v833_v16, %v828_v7 }
 0xb72   :  { %v829_v10 = vmul.f32 %v827_v0, %v823_v9 }
 0xb74   :  { %v2397_v14 = vadd.f32 %v833_v16, %v829_v10 }
 0xb76   :  { %v843_v17 = vpack.c.bf16 %v2397_v14, %v2395_v13 }
 0xb78   :  { %1782 = vmatmul.mubr.msk.bf16.vlgmr.msra.gmra.mxu0 %vm202_vm4, %v843_v17 }
 0xc38   :  { %v893_v18 = vpop.f32.mrf.mxu0 }
 0xc3a   :  { %v1783_v19 = vpop.f32.mrf.mxu0 }
 0xc3c   :  { %v896_v20 = vpop.f32.mrf.mxu0 }
 0xc3d   :  { %917 = vrot.lane.b32.xlu1 %v896_v20, %s2117_s1  ;;  %914 = vrot.lane.b32.xlu0 %v896_v20, %s2116_s30 }
 0xc3e   :  { %v1784_v21 = vpop.f32.mrf.mxu0 }
 0xc41   :  { %911 = vrot.lane.b32.xlu1 %v896_v20, %s2115_s29  ;;  %904 = vrot.lane.b32.xlu0 %v893_v18, %s2116_s30 }
 0xc45   :  { %907 = vrot.lane.b32.xlu1 %v893_v18, %s2117_s1  ;;  %901 = vrot.lane.b32.xlu0 %v893_v18, %s2115_s29 }
 0xcaf   :  { %v918_v58 = vpop.permute.xlu1 %917  ;;  %v915_v37 = vpop.permute.xlu0 %914 }
 0xcb0   :  { %v2408_v39 = vpack.c.bf16 %v918_v58, %v915_v37 }
 0xcb2   :  { %934 = vrot.lane.b32.xlu1 %v2408_v39, %s2118_s8 }
 0xcb3   :  { %v912_v24 = vpop.permute.xlu1 %911  ;;  %v905_v25 = vpop.permute.xlu0 %904 }
 0xcb4   :  { %v922_v26 = vpack.c.bf16 %v912_v24, %v896_v20 }
 0xcb6   :  { %932 = vrot.lane.b32.xlu0 %v922_v26, %s2118_s8 }
 0xcb7   :  { %v908_v27 = vpop.permute.xlu1 %907  ;;  %v902_v28 = vpop.permute.xlu0 %901 }
 0xcb8   :  { %v2413_v29 = vpack.c.bf16 %v908_v27, %v905_v25  ;;  %v2415_v30 = vpack.c.bf16 %v902_v28, %v893_v18 }
 0xcba   :  { %930 = vrot.lane.b32.xlu1 %v2413_v29, %s2118_s8  ;;  %928 = vrot.lane.b32.xlu0 %v2415_v30, %s2118_s8 }
 0xcbb   :  { %1793 = vmatprep.mubr.msk.bf16.mxu1 %vm283_vm5, %v2415_v30 }
 0xd24   :  { %v935_v31 = vpop.permute.xlu1 %934 }
 0xd25   :  { %v958_v33 = vsel %vm283_vm5, %v935_v31, 0  ;;  %1857 = vmatprep.subr.msk.bf16.mxu1 %vm283_vm5, %v935_v31 }
 0xd26   :  { %1786 = vmatpush3.bf16.xpose.msra.mxu1 %v958_v33 }
 0xd28   :  { %v933_v35 = vpop.permute.xlu0 %932 }
 0xd29   :  { %1858 = vmatprep.subr.msk.bf16.mxu1 %vm283_vm5, %v933_v35  ;;  %v955_v36 = vsel %vm283_vm5, %v933_v35, 0 }
 0xd2c   :  { %v931_v38 = vpop.permute.xlu1 %930  ;;  %v929_v41 = vpop.permute.xlu0 %928 }
 0xd2d   :  { %v952_v40 = vsel %vm283_vm5, %v931_v38, 0  ;;  %v949_v42 = vsel %vm283_vm5, %v929_v41, 0 }
 0xd2e   :  { %1788 = vmatpush3.bf16.xpose.msra.mxu1 %v955_v36 }
 0xd2f   :  { %1859 = vmatprep.subr.msk.bf16.mxu1 %vm283_vm5, %v931_v38 }
 0xd36   :  { %1790 = vmatpush3.bf16.xpose.msra.mxu1 %v952_v40 }
 0xd37   :  { %1860 = vmatprep.subr.msk.bf16.mxu1 %vm283_vm5, %v929_v41 }
 0xd3e   :  { %1792 = vmatpush3.bf16.xpose.msra.mxu1 %v949_v42 }
 0xd3f   :  { %1833 = vmatprep.subr.bf16.mxu1 %v2113_v1 }
 0xd45   :  { %1794 = vmatmul.mubr.msk.bf16.vlgmr.msra.gmra.mxu1 %vm283_vm5, %v2413_v29 }
 0xd46   :  { %1797 = vmatprep.mubr.msk.bf16.mxu1 %vm283_vm5, %v922_v26 }
 0xd4d   :  { %1798 = vmatmul.mubr.msk.bf16.gmra.mxu1 %vm283_vm5, %v2408_v39 }
 0xd4e   :  { %1837 = vmatprep.mubr.msk.bf16.mxu1 %vm2114_vm0, %v2113_v1 }
 0xe05   :  { %v1795_v34 = vpop.f32.mrf.mxu1 }
 0xe06   :  { %v1003_v55 = vadd.f32 %v1795_v34, %v2261_v50 }
 0xe07   :  { %v994_v43 = vpop.f32.mrf.mxu1 }
 0xe08   :  { %v995_v44 = vadd.f32 %v994_v43, %v2259_v49 }
 0xe09   :  { %v1796_v45 = vpop.f32.mrf.mxu1 }
 0xe0a   :  { %v1006_v22 = vadd.f32 %v1796_v45, %v2268_v57  ;;  %v1025_v46 = vsel %vm131_vm3, %v995_v44, -inf  ;;  %v1031_v57 = vsel %vm131_vm3, %v1003_v55, -inf }
 0xe0b   :  { %v997_v47 = vpop.f32.mrf.mxu1  ;;  %1026 = vmax.xlane.f32.xlu1 %v1025_v46 }
 0xe0c   :  { %v998_v51 = vadd.f32 %v997_v47, %v2264_v54  ;;  %v1034_v60 = vsel %vm131_vm3, %v1006_v22, -inf }
 0xe0d   :  { %v1799_v53 = vpop.f32.mrf.mxu1 }
 0xe0e   :  { %v1028_v59 = vsel %vm131_vm3, %v998_v51, -inf  ;;  %v1019_v54 = vadd.f32 %v1799_v53, %v2276_v2 }
 0xe0f   :  { %v1010_v62 = vpop.f32.mrf.mxu1  ;;  %1029 = vmax.xlane.f32.xlu0 %v1028_v59  ;;  %1035 = vmax.xlane.f32.xlu1 %v1034_v60 }
 0xe10   :  { %v1011_v63 = vadd.f32 %v1010_v62, %v2271_v61  ;;  %v1043_v9 = vsel %vm131_vm3, %v1019_v54, -inf }
 0xe11   :  { %v1800_v49 = vpop.f32.mrf.mxu1 }
 0xe12   :  { %v1022_v50 = vadd.f32 %v1800_v49, %v2284_v11  ;;  %v1037_v5 = vsel %vm131_vm3, %v1011_v63, -inf }
 0xe13   :  { %v1013_v0 = vpop.f32.mrf.mxu1  ;;  %1032 = vmax.xlane.f32.xlu0 %v1031_v57 }
 0xe14   :  { %v1014_v3 = vadd.f32 %v1013_v0, %v2279_v6  ;;  %v1046_v61 = vsel %vm131_vm3, %v1022_v50, -inf }
 0xe16   :  { %v1040_v7 = vsel %vm131_vm3, %v1014_v3, -inf }
 0xe17   :  { %1038 = vmax.xlane.f32.xlu0 %v1037_v5  ;;  %1041 = vmax.xlane.f32.xlu1 %v1040_v7 }
 0xe1b   :  { %1044 = vmax.xlane.f32.xlu0 %v1043_v9  ;;  %1047 = vmax.xlane.f32.xlu1 %v1046_v61 }
 0xe2c   :  { %1121 = vrot.lane.b32.xlu1 %v922_v26, %s2105_s27 }
 0xe31   :  { %1123 = vrot.lane.b32.xlu0 %v2408_v39, %s2105_s27 }
 0xe94   :  { %v1027_v2 = vpop.xlane.xlu1 %1026 }
 0xe95   :  { %v1049_v17 = vsub.f32 %v995_v44, %v1027_v2 }
 0xe97   :  { %v1057_v58 = vmul.f32 1.442695, %v1049_v17 }
 0xe98   :  { %v1030_v6 = vpop.xlane.xlu0 %1029  ;;  %v1036_v11 = vpop.xlane.xlu1 %1035 }
 0xe99   :  { %v1050_v16 = vsub.f32 %v998_v51, %v1030_v6  ;;  %v1052_v10 = vsub.f32 %v1006_v22, %v1036_v11 }
 0xe9b   :  { %v1063_v18 = vmul.f32 1.442695, %v1052_v10  ;;  %v1059_v19 = vmul.f32 1.442695, %v1050_v16 }
 0xe9c   :  { %v1033_v20 = vpop.xlane.xlu0 %1032 }
 0xe9d   :  { %v1051_v21 = vsub.f32 %v1003_v55, %v1033_v20  ;;  %1966 = vpow2.f32 %v1063_v18 }
 0xe9e   :  { %1968 = vpow2.f32 %v1059_v19 }
 0xe9f   :  { %v1061_v37 = vmul.f32 1.442695, %v1051_v21 }
 0xea0   :  { %v1039_v24 = vpop.xlane.xlu0 %1038  ;;  %v1042_v25 = vpop.xlane.xlu1 %1041 }
 0xea1   :  { %1970 = vpow2.f32 %v1061_v37  ;;  %v1053_v26 = vsub.f32 %v1011_v63, %v1039_v24  ;;  %v1054_v39 = vsub.f32 %v1014_v3, %v1042_v25 }
 0xea2   :  { %1972 = vpow2.f32 %v1057_v58 }
 0xea3   :  { %v1065_v35 = vmul.f32 1.442695, %v1053_v26  ;;  %v1067_v40 = vmul.f32 1.442695, %v1054_v39 }
 0xea4   :  { %v1045_v27 = vpop.xlane.xlu0 %1044  ;;  %v1048_v28 = vpop.xlane.xlu1 %1047 }
 0xea5   :  { %v1055_v31 = vsub.f32 %v1019_v54, %v1045_v27  ;;  %v1056_v33 = vsub.f32 %v1022_v50, %v1048_v28 }
 0xea7   :  { %v1069_v36 = vmul.f32 1.442695, %v1055_v31  ;;  %v1071_v38 = vmul.f32 1.442695, %v1056_v33 }
 0xea8   :  { %v1124_v41 = vpop.permute.xlu0 %1123  ;;  %v1122_v42 = vpop.permute.xlu1 %1121 }
 0xea9   :  { %1974 = vpow2.f32 %v1069_v36  ;;  %1801 = vmatprep.subr.bf16.mxu0 %v1124_v41 }
 0xeaa   :  { %1976 = vpow2.f32 %v1071_v38  ;;  %1802 = vmatpush3.bf16.msra.mxu0 %v1124_v41  ;;  %v1967_v34 = vpop.eup %1966 }
 0xeab   :  { %1978 = vpow2.f32 %v1065_v35  ;;  %1803 = vmatprep.subr.bf16.mxu0 %v1122_v42  ;;  %v1082_v43 = vsel %vm131_vm3, %v1967_v34, 0.0  ;;  %v1969_v44 = vpop.eup %1968 }
 0xeac   :  { %1980 = vpow2.f32 %v1067_v40  ;;  %1083 = vadd.xlane.f32.xlu1 %v1082_v43  ;;  %v1076_v47 = vsel %vm131_vm3, %v1969_v44, 0.0 }
 0xeae   :  { %v1971_v45 = vpop.eup %1970  ;;  %1804 = vmatpush3.bf16.msra.mxu0 %v1122_v42 }
 0xeaf   :  { %v1079_v22 = vsel %vm131_vm3, %v1971_v45, 0.0  ;;  %v1973_v46 = vpop.eup %1972 }
 0xeb0   :  { %1080 = vadd.xlane.f32.xlu0 %v1079_v22  ;;  %1077 = vadd.xlane.f32.xlu1 %v1076_v47  ;;  %v1073_v51 = vsel %vm131_vm3, %v1973_v46, 0.0 }
 0xeb4   :  { %1074 = vadd.xlane.f32.xlu0 %v1073_v51 }
 0xeb6   :  { %v1975_v53 = vpop.eup %1974 }
 0xeb7   :  { %v1977_v55 = vpop.eup %1976  ;;  %v1091_v59 = vsel %vm131_vm3, %v1975_v53, 0.0 }
 0xeb8   :  { %v1979_v60 = vpop.eup %1978  ;;  %1092 = vadd.xlane.f32.xlu0 %v1091_v59  ;;  %v1094_v62 = vsel %vm131_vm3, %v1977_v55, 0.0 }
 0xeb9   :  { %v1981_v49 = vpop.eup %1980  ;;  %1095 = vadd.xlane.f32.xlu1 %v1094_v62  ;;  %v1085_v63 = vsel %vm131_vm3, %v1979_v60, 0.0 }
 0xeba   :  { %v1088_v57 = vsel %vm131_vm3, %v1981_v49, 0.0 }
 0xebc   :  { %1086 = vadd.xlane.f32.xlu0 %v1085_v63 }
 0xebd   :  { %1089 = vadd.xlane.f32.xlu1 %v1088_v57 }
 0xece   :  { %1119 = vrot.lane.b32.xlu1 %v2413_v29, %s2105_s27 }
 0xed2   :  { %1117 = vrot.lane.b32.xlu0 %v2415_v30, %s2105_s27  ;;  %1239 = vrot.lane.b32.xlu1 %v2380_v48, %s2119_s9 }
 0xf35   :  { %v1084_v0 = vpop.xlane.xlu1 %1083 }
 0xf39   :  { %v1081_v3 = vpop.xlane.xlu0 %1080  ;;  %v1078_v54 = vpop.xlane.xlu1 %1077 }
 0xf3a   :  { %1982 = vrcp.f32 %v1078_v54 }
 0xf3b   :  { %1984 = vrcp.f32 %v1081_v3 }
 0xf3d   :  { %v1075_v50 = vpop.xlane.xlu0 %1074 }
 0xf3e   :  { %1986 = vrcp.f32 %v1075_v50 }
 0xf3f   :  { %1988 = vrcp.f32 %v1084_v0 }
 0xf41   :  { %v1093_v5 = vpop.xlane.xlu0 %1092 }
 0xf42   :  { %v1096_v7 = vpop.xlane.xlu1 %1095  ;;  %1990 = vrcp.f32 %v1093_v5 }
 0xf43   :  { %1992 = vrcp.f32 %v1096_v7 }
 0xf45   :  { %v1087_v9 = vpop.xlane.xlu0 %1086 }
 0xf46   :  { %1994 = vrcp.f32 %v1087_v9  ;;  %v1090_v29 = vpop.xlane.xlu1 %1089 }
 0xf47   :  { %1996 = vrcp.f32 %v1090_v29  ;;  %v1983_v30 = vpop.eup %1982 }
 0xf48   :  { %v1985_v61 = vpop.eup %1984  ;;  %v1106_v10 = vmul.f32 %v1983_v30, %v1969_v44 }
 0xf49   :  { %v1118_v11 = vpop.permute.xlu0 %1117  ;;  %v1107_v17 = vmul.f32 %v1985_v61, %v1971_v45 }
 0xf4a   :  { %v1120_v2 = vpop.permute.xlu1 %1119 }
 0xf4b   :  { %v1987_v48 = vpop.eup %1986  ;;  %1805 = vmatprep.subr.bf16.mxu0 %v1120_v2 }
 0xf4c   :  { %v1989_v6 = vpop.eup %1988  ;;  %1806 = vmatpush3.bf16.msra.mxu0 %v1120_v2  ;;  %v1105_v16 = vmul.f32 %v1987_v48, %v1973_v46 }
 0xf4d   :  { %1807 = vmatprep.subr.bf16.mxu0 %v1118_v11  ;;  %v1108_v19 = vmul.f32 %v1989_v6, %v1967_v34 }
 0xf4e   :  { %v1113_v18 = vpack.c.bf16 %v1106_v10, %v1105_v16  ;;  %v1240_v33 = vpop.permute.xlu1 %1239 }
 0xf4f   :  { %v1991_v20 = vpop.eup %1990  ;;  %v1114_v21 = vpack.c.bf16 %v1108_v19, %v1107_v17 }
 0xf50   :  { %1808 = vmatpush3.bf16.msra.mxu0 %v1118_v11  ;;  %1809 = vmatprep.mubr.msk.bf16.mxu0 %vm131_vm3, %v1113_v18  ;;  %v1993_v58 = vpop.eup %1992  ;;  %v1111_v39 = vmul.f32 %v1991_v20, %v1975_v53 }
 0xf51   :  { %1817 = vmatprep.subr.bf16.mxu0 %v2113_v1  ;;  %v1112_v27 = vmul.f32 %v1993_v58, %v1977_v55 }
 0xf53   :  { %v1995_v37 = vpop.eup %1994  ;;  %1810 = vmatmul.mubr.msk.bf16.vlgmr.msra.gmra.mxu0 %vm131_vm3, %v1114_v21  ;;  %v1116_v31 = vpack.c.bf16 %v1112_v27, %v1111_v39 }
 0xf54   :  { %v1997_v24 = vpop.eup %1996  ;;  %v1109_v25 = vmul.f32 %v1995_v37, %v1979_v60  ;;  %1818 = vmatpush3.bf16.msra.mxu0 %v1240_v33 }
 0xf55   :  { %v1110_v26 = vmul.f32 %v1997_v24, %v1981_v49  ;;  %1819 = vmatprep.subr.bf16.mxu0 %v2113_v1  ;;  %v1924_v24 = vld [vmem:[#allocation6 + $0x34] ss:$8 sps:$4 sm:$0xff]  }
 0xf57   :  { %v1115_v28 = vpack.c.bf16 %v1110_v26, %v1109_v25  ;;  %v1925_v25 = vld [vmem:[#allocation6 + $0x24] ss:$8 sps:$4 sm:$0xff]  }
 0xf59   :  { %1813 = vmatprep.mubr.msk.bf16.mxu0 %vm131_vm3, %v1115_v28 }
 0xf5b   :  { %1814 = vmatmul.mubr.msk.bf16.gmra.mxu0 %vm131_vm3, %v1116_v31 }
 0xf5c   :  { %1821 = vmatprep.mubr.msk.bf16.mxu0 %vm2114_vm0, %v2113_v1 }
0x1013   :  { %v1811_v35 = vpop.f32.mrf.mxu0 }
0x1015   :  { %v1175_v36 = vpop.f32.mrf.mxu0 }
0x1017   :  { %v1812_v38 = vpop.f32.mrf.mxu0 }
0x1019   :  { %v1178_v40 = vpop.f32.mrf.mxu0 }
0x101b   :  { %v1815_v41 = vpop.f32.mrf.mxu0 }
0x101c   :  { %v1895_v42 = vpack.i.bf16 %v1815_v41, %v1811_v35 }
0x101d   :  { %v1191_v34 = vpop.f32.mrf.mxu0 }
0x101e   :  { %1896 = vrot.lane.b32.xlu1 %v1895_v42, %s2120_s10 }
0x101f   :  { %v1816_v43 = vpop.f32.mrf.mxu0 }
0x1020   :  { %v1905_v22 = vpack.i.bf16 %v1816_v43, %v1812_v38  ;;  %v2507_v38 = vld [vmem:[#allocation7 + $0x8] sm:$0xff] }
0x1021   :  { %v1194_v44 = vpop.f32.mrf.mxu0  ;;  %v1318_v42 = vrot.slane %v2507_v38, %v668_v56  ;;  %v1331_v56 = vrot.slane %v2507_v38, %v681_v12 }
0x1022   :  { %v1900_v45 = vpack.i.bf16 %v1194_v44, %v1178_v40  ;;  %1237 = vrot.lane.b32.xlu1 %v2383_v23, %s2119_s9 }
0x1024   :  { %1901 = vrot.lane.b32.xlu0 %v1900_v45, %s2109_s12  ;;  %v1324_v45 = vrot.slane %v2507_v38, %v674_v15 }
0x1028   :  { %1906 = vrot.lane.b32.xlu0 %v1905_v22, %s2121_s11 }
0x1090   :  { %v1897_v46 = vpop.permute.xlu1 %1896 }
0x1091   :  { %v1899_v62 = vunpack.i.h.bf16 %v1897_v46  ;;  %v1898_v49 = vunpack.i.l.bf16 %v1897_v46 }
0x1094   :  { %v1238_v47 = vpop.permute.xlu1 %1237 }
0x1095   :  { %1820 = vmatpush3.bf16.msra.mxu0 %v1238_v47 }
0x1096   :  { %v1902_v51 = vpop.permute.xlu0 %1901  ;;  %1825 = vmatprep.subr.bf16.mxu0 %v2113_v1 }
0x1097   :  { %v1904_v53 = vunpack.i.h.bf16 %v1902_v51  ;;  %v1903_v55 = vunpack.i.l.bf16 %v1902_v51 }
0x1099   :  { %v1233_v59 = vsel %vm283_vm5, %v1191_v34, %v1904_v53  ;;  %v1218_v60 = vsel %vm283_vm5, %v1175_v36, %v1903_v55 }
0x109a   :  { %v1907_v23 = vpop.permute.xlu0 %1906  ;;  %v1219_v0 = vsel %vm567_vm6, %v1218_v60, %v1898_v49  ;;  %v1234_v3 = vsel %vm567_vm6, %v1233_v59, %v1899_v62 }
0x109b   :  { %v1909_v63 = vunpack.i.h.bf16 %v1907_v23  ;;  %v1908_v57 = vunpack.i.l.bf16 %v1907_v23 }
0x109d   :  { %v1220_v54 = vsel %vm569_vm7, %v1219_v0, %v1908_v57  ;;  %v1235_v50 = vsel %vm569_vm7, %v1234_v3, %v1909_v63  ;;  %v1390_v3 = vrot.slane %v2507_v38, %v740_v32 }
0x109e   :  { %v1236_v5 = vpack.c.bf16 %v1235_v50, %v1220_v54 }
0x10a0   :  { %1822 = vmatmul.mubr.msk.bf16.vlgmr.msra.gmra.mxu0 %vm202_vm4, %v1236_v5 }
0x10a1   :  { %1829 = vmatprep.mubr.msk.bf16.mxu0 %vm2114_vm0, %v2113_v1  ;;  %1826 = vmatpush3.bf16.msra.mxu0 %v1924_v24 }
0x10a2   :  { %1827 = vmatprep.subr.bf16.mxu0 %v2113_v1 }
0x10a5   :  { %1828 = vmatpush3.bf16.msra.mxu0 %v1925_v25 }
0x10a6   :  { %1841 = vmatprep.subr.bf16.mxu0 %v2113_v1 }
0x1160   :  { %v1280_v7 = vpop.f32.mrf.mxu0 }
0x1161   :  { %v1287_v9 = vadd.f32 %v1280_v7, %v2395_v13 }
0x1162   :  { %v1823_v29 = vpop.f32.mrf.mxu0 }
0x1163   :  { %v1289_v30 = vsel %vm202_vm4, %v1287_v9, 0.0 }
0x1164   :  { %1290 = vadd.xlane.f32.xlu0 %v1289_v30  ;;  %v1283_v61 = vpop.f32.mrf.mxu0 }
0x1165   :  { %v1288_v2 = vadd.f32 %v1283_v61, %v2397_v14 }
0x1166   :  { %v1824_v48 = vpop.f32.mrf.mxu0 }
0x1167   :  { %v1292_v6 = vsel %vm202_vm4, %v1288_v2, 0.0  ;;  %v2014_v48 = vld [vmem:[#allocation4 + $0x18] sm:$0xff]  }
0x1168   :  { %1293 = vadd.xlane.f32.xlu1 %v1292_v6 }
0x1179   :  { %1393 = vrot.lane.b32.xlu1 %v1924_v24, %s2105_s27  ;;  %v2017_v24 = vld [vmem:[#allocation4 + $0x10] sm:$0xff]  }
0x11ed   :  { %v1291_v11 = vpop.xlane.xlu0 %1290 }
0x11ee   :  { %v1295_v16 = vmul.f32 0.03125, %v1291_v11 }
0x11f0   :  { %v1297_v10 = vsub.f32 %v1287_v9, %v1295_v16 }
0x11f1   :  { %v1294_v17 = vpop.xlane.xlu1 %1293 }
0x11f2   :  { %v1296_v18 = vmul.f32 0.03125, %v1294_v17  ;;  %v1299_v19 = vmul.f32 %v1297_v10, %v1297_v10 }
0x11f4   :  { %v1298_v20 = vsub.f32 %v1288_v2, %v1296_v18  ;;  %v1301_v21 = vsel %vm202_vm4, %v1299_v19, 0.0 }
0x11f5   :  { %1302 = vadd.xlane.f32.xlu0 %v1301_v21  ;;  %v1394_v35 = vpop.permute.xlu1 %1393 }
0x11f6   :  { %v1300_v58 = vmul.f32 %v1298_v20, %v1298_v20  ;;  %v1402_v36 = vsel %vm131_vm3, %v1394_v35, 0 }
0x11f7   :  { %1834 = vmatpush3.bf16.xpose.msra.mxu1 %v1402_v36 }
0x11f8   :  { %v1304_v37 = vsel %vm202_vm4, %v1300_v58, 0.0  ;;  %1835 = vmatprep.subr.bf16.mxu1 %v2113_v1  ;;  %v2015_v58 = vld [vmem:[#allocation4 + $0x8] sm:$0xff]  }
0x11f9   :  { %1305 = vadd.xlane.f32.xlu0 %v1304_v37  ;;  %v2016_v37 = vld [vmem:[#allocation4] sm:$0xff]  }
0x120f   :  { %1391 = vrot.lane.b32.xlu0 %v1925_v25, %s2105_s27 }
0x127e   :  { %v1303_v26 = vpop.xlane.xlu0 %1302 }
0x127f   :  { %v1307_v39 = vmul.f32 0.03125, %v1303_v26 }
0x1281   :  { %v1309_v27 = vadd.f32 1e-05, %v1307_v39 }
0x1282   :  { %v1306_v28 = vpop.xlane.xlu0 %1305 }
0x1283   :  { %1998 = vrsqrt.f32 %v1309_v27  ;;  %v1308_v31 = vmul.f32 0.03125, %v1306_v28 }
0x1285   :  { %v1310_v33 = vadd.f32 1e-05, %v1308_v31 }
0x1286   :  { %v1392_v53 = vpop.permute.xlu0 %1391 }
0x1287   :  { %2000 = vrsqrt.f32 %v1310_v33  ;;  %v1399_v55 = vsel %vm131_vm3, %v1392_v53, 0 }
0x1288   :  { %1836 = vmatpush3.bf16.xpose.msra.mxu1 %v1399_v55 }
0x1290   :  { %v1999_v40 = vpop.eup %1998 }
0x1291   :  { %v1313_v41 = vmul.f32 %v1999_v40, %v1297_v10 }
0x1293   :  { %v1319_v44 = vmul.f32 %v1318_v42, %v1313_v41 }
0x1294   :  { %v2001_v34 = vpop.eup %2000 }
0x1295   :  { %v1314_v43 = vmul.f32 %v2001_v34, %v1298_v20  ;;  %v1325_v46 = vadd.f32 %v1324_v45, %v1319_v44 }
0x1297   :  { %v1320_v22 = vmul.f32 %v1318_v42, %v1314_v43  ;;  %v1476_v43 = vrot.slane %v2507_v38, %v826_v8  ;;  %v1633_v8 = vld [vmem:[%s2568_s6] ss:$0 sm:$0xff] }
0x1299   :  { %v1326_v47 = vadd.f32 %v1324_v45, %v1320_v22 }
0x129b   :  { %v1327_v51 = vpack.c.bf16 %v1326_v47, %v1325_v46 }
0x129d   :  { %1830 = vmatmul.mubr.msk.bf16.vlgmr.msra.gmra.mxu0 %vm202_vm4, %v1327_v51  ;;  %v1482_v51 = vrot.slane %v2507_v38, %v832_v4 }
0x129e   :  { %1849 = vmatprep.mubr.msk.bf16.mxu0 %vm2114_vm0, %v2113_v1 }
0x135d   :  { %v1377_v59 = vpop.f32.mrf.mxu0 }
0x135e   :  { %v1378_v15 = vadd.f32 %v1377_v59, %v1331_v56 }
0x135f   :  { %v1831_v60 = vpop.f32.mrf.mxu0 }
0x1360   :  { %v1384_v63 = vmax.f32 %v1378_v15, 0.0 }
0x1361   :  { %v1380_v62 = vpop.f32.mrf.mxu0 }
0x1362   :  { %v1381_v49 = vadd.f32 %v1380_v62, %v1331_v56 }
0x1363   :  { %v1832_v23 = vpop.f32.mrf.mxu0 }
0x1364   :  { %v1385_v57 = vmax.f32 %v1381_v49, 0.0 }
0x1366   :  { %v1386_v0 = vpack.c.bf16 %v1385_v57, %v1384_v63 }
0x1368   :  { %1838 = vmatmul.mubr.msk.bf16.vlgmr.msra.gmra.mxu1 %vm131_vm3, %v1386_v0 }
0x1428   :  { %v1438_v54 = vpop.f32.mrf.mxu1 }
0x1429   :  { %v1439_v50 = vadd.f32 %v1438_v54, %v1390_v3 }
0x142a   :  { %v1839_v5 = vpop.f32.mrf.mxu1 }
0x142b   :  { %v1445_v12 = vadd.f32 %v1439_v50, %v2395_v13 }
0x142c   :  { %v1441_v7 = vpop.f32.mrf.mxu1 }
0x142d   :  { %v1442_v9 = vadd.f32 %v1441_v7, %v1390_v3  ;;  %v1447_v29 = vsel %vm202_vm4, %v1445_v12, 0.0 }
0x142e   :  { %1448 = vadd.xlane.f32.xlu1 %v1447_v29  ;;  %v1840_v30 = vpop.f32.mrf.mxu1 }
0x142f   :  { %v1446_v61 = vadd.f32 %v1442_v9, %v2397_v14 }
0x1431   :  { %v1450_v2 = vsel %vm202_vm4, %v1446_v61, 0.0 }
0x1432   :  { %1451 = vadd.xlane.f32.xlu0 %v1450_v2 }
0x143f   :  { %1499 = vrot.lane.b32.xlu1 %v2014_v48, %s2118_s8 }
0x14b7   :  { %v1449_v32 = vpop.xlane.xlu1 %1448 }
0x14b8   :  { %v1453_v6 = vmul.f32 0.03125, %v1449_v32 }
0x14ba   :  { %v1455_v11 = vsub.f32 %v1445_v12, %v1453_v6 }
0x14bb   :  { %v1452_v16 = vpop.xlane.xlu0 %1451  ;;  %v1500_v10 = vpop.permute.xlu1 %1499 }
0x14bc   :  { %v1454_v13 = vmul.f32 0.03125, %v1452_v16  ;;  %v1457_v17 = vmul.f32 %v1455_v11, %v1455_v11  ;;  %v1514_v18 = vsel %vm202_vm4, %v1500_v10, 0 }
0x14bd   :  { %1842 = vmatpush3.bf16.xpose.msra.mxu0 %v1514_v18 }
0x14be   :  { %v1456_v19 = vsub.f32 %v1446_v61, %v1454_v13  ;;  %v1459_v20 = vsel %vm202_vm4, %v1457_v17, 0.0  ;;  %1843 = vmatprep.subr.bf16.mxu0 %v2113_v1 }
0x14bf   :  { %1460 = vadd.xlane.f32.xlu1 %v1459_v20 }
0x14c0   :  { %v1458_v14 = vmul.f32 %v1456_v19, %v1456_v19 }
0x14c2   :  { %v1462_v21 = vsel %vm202_vm4, %v1458_v14, 0.0 }
0x14c3   :  { %1463 = vadd.xlane.f32.xlu0 %v1462_v21 }
0x14d0   :  { %1495 = vrot.lane.b32.xlu1 %v2015_v58, %s2118_s8 }
0x14d4   :  { %1493 = vrot.lane.b32.xlu1 %v2016_v37, %s2118_s8 }
0x14d9   :  { %1497 = vrot.lane.b32.xlu0 %v2017_v24, %s2118_s8 }
0x1548   :  { %v1461_v25 = vpop.xlane.xlu1 %1460 }
0x1549   :  { %v1465_v26 = vmul.f32 0.03125, %v1461_v25 }
0x154b   :  { %v1467_v39 = vadd.f32 1e-05, %v1465_v26 }
0x154c   :  { %v1464_v27 = vpop.xlane.xlu0 %1463  ;;  %v1496_v36 = vpop.permute.xlu1 %1495 }
0x154d   :  { %2002 = vrsqrt.f32 %v1467_v39  ;;  %v1466_v28 = vmul.f32 0.03125, %v1464_v27  ;;  %v1508_v40 = vsel %vm202_vm4, %v1496_v36, 0 }
0x154f   :  { %v1468_v31 = vadd.f32 1e-05, %v1466_v28 }
0x1550   :  { %v1498_v33 = vpop.permute.xlu0 %1497  ;;  %v1494_v42 = vpop.permute.xlu1 %1493 }
0x1551   :  { %2004 = vrsqrt.f32 %v1468_v31  ;;  %v1511_v35 = vsel %vm202_vm4, %v1498_v33, 0  ;;  %v1505_v22 = vsel %vm202_vm4, %v1494_v42, 0 }
0x1552   :  { %1844 = vmatpush3.bf16.xpose.msra.mxu0 %v1511_v35 }
0x1553   :  { %1845 = vmatprep.subr.bf16.mxu0 %v2113_v1 }
0x155a   :  { %v2003_v41 = vpop.eup %2002  ;;  %1846 = vmatpush3.bf16.xpose.msra.mxu0 %v1508_v40 }
0x155b   :  { %1847 = vmatprep.subr.bf16.mxu0 %v2113_v1  ;;  %v1471_v34 = vmul.f32 %v2003_v41, %v1455_v11 }
0x155d   :  { %v1477_v46 = vmul.f32 %v1476_v43, %v1471_v34 }
0x155e   :  { %v2005_v44 = vpop.eup %2004 }
0x155f   :  { %v1472_v45 = vmul.f32 %v2005_v44, %v1456_v19  ;;  %v1483_v55 = vadd.f32 %v1482_v51, %v1477_v46 }
0x1561   :  { %v1478_v47 = vmul.f32 %v1476_v43, %v1472_v45 }
0x1562   :  { %1848 = vmatpush3.bf16.xpose.msra.mxu0 %v1505_v22 }
0x1563   :  { %v1484_v53 = vadd.f32 %v1482_v51, %v1478_v47 }
0x1565   :  { %v1485_v1 = vpack.c.bf16 %v1484_v53, %v1483_v55 }
0x1569   :  { %1850 = vmatmul.mubr.msk.bf16.vlgmr.msra.gmra.mxu0 %vm202_vm4, %v1485_v1 }
0x1629   :  { %v1550_v56 = vpop.f32.mrf.mxu0 }
0x162a   :  { %v1551_v59 = vadd.f32 %v1633_v8, %v1550_v56 }
0x162b   :  { %v1851_v60 = vpop.f32.mrf.mxu0 }
0x162c   :  { %v1557_v15 = vsel %vm131_vm3, %v1551_v59, -inf }
0x162d   :  { %1558 = vmax.xlane.f32.xlu1 %v1557_v15  ;;  %v1553_v62 = vpop.f32.mrf.mxu0 }
0x162e   :  { %v1554_v52 = vadd.f32 %v1633_v8, %v1553_v62 }
0x162f   :  { %v1852_v49 = vpop.f32.mrf.mxu0 }
0x1630   :  { %v1560_v4 = vsel %vm131_vm3, %v1554_v52, -inf }
0x1631   :  { %1561 = vmax.xlane.f32.xlu0 %v1560_v4 }
0x16b6   :  { %v1559_v38 = vpop.xlane.xlu1 %1558 }
0x16b7   :  { %v1563_v23 = vsub.f32 %v1551_v59, %v1559_v38 }
0x16b9   :  { %v1565_v0 = vmul.f32 1.442695, %v1563_v23 }
0x16ba   :  { %v1562_v63 = vpop.xlane.xlu0 %1561 }
0x16bb   :  { %v1564_v57 = vsub.f32 %v1554_v52, %v1562_v63 }
0x16bd   :  { %v1567_v3 = vmul.f32 1.442695, %v1564_v57 }
0x16bf   :  { %2006 = vpow2.f32 %v1567_v3 }
0x16c0   :  { %2008 = vpow2.f32 %v1565_v0 }
0x16cc   :  { %v2007_v54 = vpop.eup %2006 }
0x16cd   :  { %v1572_v50 = vsel %vm131_vm3, %v2007_v54, 0.0  ;;  %v2009_v5 = vpop.eup %2008 }
0x16ce   :  { %1573 = vadd.xlane.f32.xlu0 %v1572_v50  ;;  %v1569_v12 = vsel %vm131_vm3, %v2009_v5, 0.0 }
0x16d2   :  { %1570 = vadd.xlane.f32.xlu0 %v1569_v12 }
0x1757   :  { %v1574_v7 = vpop.xlane.xlu0 %1573 }
0x1758   :  { %2010 = vlog2.f32 %v1574_v7 }
0x175b   :  { %v1571_v2 = vpop.xlane.xlu0 %1570 }
0x175c   :  { %2012 = vlog2.f32 %v1571_v2 }
0x1765   :  { %v2011_v9 = vpop.eup %2010 }
0x1766   :  { %v1578_v29 = vmul.f32 0.6931472, %v2011_v9 }
0x1768   :  { %v1580_v30 = vadd.f32 %v1578_v29, %v1562_v63 }
0x1769   :  { %v2013_v48 = vpop.eup %2012 }
0x176a   :  { %v1582_v61 = vsub.f32 %v1554_v52, %v1580_v30  ;;  %v1576_v32 = vmul.f32 0.6931472, %v2013_v48 }
0x176c   :  { %1584 = vrot.lane.b32.xlu1 %v1582_v61, %s2105_s27  ;;  %v1579_v6 = vadd.f32 %v1576_v32, %v1559_v38 }
0x176e   :  { %v1581_v11 = vsub.f32 %v1551_v59, %v1579_v6 }
0x17de   :  { %v1585_v16 = vpop.permute.xlu1 %1584 }
0x17df   :  { %v1587_v10 = vsel %vm131_vm3, %v1581_v11, %v1585_v16 }
0x17e0   :  { %1588 = vst [vmem:[%s2569_s7] sm:$0xff] %v1587_v10 }
0x17e1   :  { %1593 = vsyncpa [#allocation3], 1 }
0x17e2   :  { %1594 = vsyncpa [#allocation5], 1 }
0x17e3   :  { %1595 = vsyncpa [#allocation8], 1 }

</bundles_post_ra>
